<compile_context>
chip_gen: v6e
topology: v6e:2x2x1
jax: 0.10.0
libtpu: 0.0.40
codegen_flags: <defaults>
</compile_context>

<pallas_src>
import math
import functools

import jax
import jax.numpy as jnp
from jax.experimental import pallas as pl
from jax.experimental.pallas import tpu as pltpu


def _dyn_graph_kernel(cat_ref, w1_ref, b1_ref, wfc1t_ref, wfc2_ref,
                      norm_adj_ref, adj_ref, nf_ref,
                      *, scale, n_real, tn, approx_recip):
    t = pl.program_id(1)
    bt, n_pad, c_in = cat_ref.shape
    ch = w1_ref.shape[1]

    # ---- once per batch tile: node features + squeeze-excite scale --------
    @pl.when(t == 0)
    def _():
        # node_feature = start_FC(cat([input, hidden], -1))
        # batch folded into the M dimension -> one well-shaped MXU matmul.
        cat2 = cat_ref[...].reshape(bt * n_pad, c_in)
        nf = jnp.dot(cat2, w1_ref[...],
                     preferred_element_type=jnp.float32) + b1_ref[...]
        nf = nf.reshape(bt, n_pad, ch)                          # (Bt, Npad, Ch)

        # residual = AdaptiveAvgPool1d(1) over the feature axis
        pooled = jnp.mean(nf, axis=-1, keepdims=True)           # (Bt, Npad, 1)

        # fc: Linear(N->r, no bias) . ReLU . Linear(r->N, no bias) . Sigmoid
        # Kept on VPU/XLU (broadcast-multiply + reduce); the MXU stays free and
        # no 1-lane-wide matmul sits on the critical path.  Padded rows of
        # wfc1t are zero, so padded pooled rows never contribute.
        z = jnp.maximum(
            jnp.sum(wfc1t_ref[...][None] * pooled, axis=1), 0.0)        # (Bt, r)
        s = jax.nn.sigmoid(
            jnp.sum(wfc2_ref[...][None] * z[:, None, :], axis=-1,
                    keepdims=True))                                      # (Bt, Npad, 1)

        if n_real != n_pad:
            # zero the scale of padded node rows so they cannot pollute the
            # similarity matrix / row sums
            node_ids = jax.lax.broadcasted_iota(jnp.int32, (1, n_pad, 1), 1)
            s = jnp.where(node_ids < n_real, s, 0.0)

        # node_feature = residual.expand_as(node_feature) * node_feature
        nf_ref[...] = (nf * s).astype(nf_ref.dtype)

    # ---- per row tile: (Bt, tn, Npad) slice of similarity / adj / norm_adj --
    row0 = pl.multiple_of(t * tn, tn)
    nf_q = nf_ref[:, pl.ds(row0, tn), :]                        # (Bt, tn, Ch)
    nf_k = nf_ref[...]                                          # (Bt, Npad, Ch)

    # similarity = nf @ nf^T / sqrt(hidden_dim)  (NT contraction, f32 accum).
    # alpha and 1/sqrt(hidden_dim) are folded into `scale` -> one N^2 multiply.
    gram = jax.lax.dot_general(
        nf_q, nf_k, dimension_numbers=(((2,), (2,)), ((0,), (0,))),
        preferred_element_type=jnp.float32)                     # (Bt, tn, Npad)

    # norm == 'D-1':  adj = relu(tanh(alpha * sim))
    adj = jnp.maximum(jnp.tanh(gram * scale), 0.0)
    row_sum = jnp.sum(adj, axis=-1, keepdims=True)              # (Bt, tn, 1)
    # reciprocal-then-multiply (N reciprocals + N^2 muls instead of N^2 divides);
    # guard all-zero rows (padded rows / degenerate real rows) against 1/0.
    inv = pl.reciprocal(jnp.where(row_sum > 0.0, row_sum, 1.0),
                        approx=approx_recip)
    adj_ref[...] = adj
    norm_adj_ref[...] = adj * inv
    # TODO(synk): the 'softmax' norm branch of the module is not implemented
    # (module default is 'D-1').


def _round_up(v, m):
    return ((v + m - 1) // m) * m


def _pick_batch_tile(batch, n_pad):
    # process several batch elements per grid step when N is small
    cap = max(1, 1024 // n_pad)
    best = 1
    for d in range(1, batch + 1):
        if batch % d == 0 and d <= cap:
            best = d
    return best


def _pick_row_tile(n_pad, bt, out_budget_bytes=16 * 1024 * 1024):
    # largest multiple-of-128 divisor of n_pad such that the two double-buffered
    # (Bt, tn, Npad) f32 output blocks stay well inside scoped VMEM:
    #   2 outputs * 2 buffers * bt * tn * n_pad * 4 bytes  <= out_budget
    cap_rows = max(128, out_budget_bytes // (16 * bt * n_pad))
    cap_rows = min(cap_rows, 1024)
    best = 128
    d = 128
    while d <= n_pad:
        if n_pad % d == 0 and d <= cap_rows:
            best = d
        d += 128
    return best


def dynamic_graph_generate(x, hidden, w_start, b_start, w_fc1, w_fc2,
                           *, alpha=3.0, gram_dtype=jnp.bfloat16):
    """Forward pass of DynamicGraphGenerate (norm='D-1').

    x:       (B, N, Cin)  f32;  hidden: (B, N, Ch) f32
    w_start: torch Linear weight (Ch, Cin+Ch);  b_start: (Ch,)
    w_fc1:   torch Linear weight (r, N);        w_fc2:  torch Linear weight (N, r)
    gram_dtype: dtype used for the N x N Gram matmul inputs (bf16 = fast MXU
                path, f32 = exact).  Accumulation is always f32.
    Returns (norm_adj, adj), each (B, N, N) float32.
    """
    B, N, Cin = x.shape
    Ch = hidden.shape[-1]
    r = w_fc1.shape[0]
    C = Cin + Ch

    # ---- host-side prep: concat once, transpose weights, pad node dim ------
    n_pad = _round_up(N, 128)          # lane-dense outputs (unmasked stores)
    pad = n_pad - N
    xp = jnp.pad(x, ((0, 0), (0, pad), (0, 0))) if pad else x
    hp = jnp.pad(hidden, ((0, 0), (0, pad), (0, 0))) if pad else hidden
    cat = jnp.concatenate([xp, hp], axis=-1).astype(jnp.float32)    # (B, Npad, C)

    w1 = jnp.transpose(w_start).astype(jnp.float32)                 # (C, Ch)
    b1 = b_start.reshape(1, Ch).astype(jnp.float32)                 # (1, Ch)
    wfc1t = jnp.transpose(w_fc1).astype(jnp.float32)                # (N, r)
    if pad:
        wfc1t = jnp.pad(wfc1t, ((0, pad), (0, 0)))                  # (Npad, r)
    wfc2 = w_fc2.astype(jnp.float32)                                # (N, r)
    if pad:
        wfc2 = jnp.pad(wfc2, ((0, pad), (0, 0)))                    # (Npad, r)

    bt = _pick_batch_tile(B, n_pad)
    tn = _pick_row_tile(n_pad, bt)
    grid = (B // bt, n_pad // tn)

    # torch forward: batch_size, node_num, hidden_dim = x.shape  -> hidden_dim == Cin
    scale = float(alpha) / math.sqrt(float(Cin))
    approx_recip = jnp.dtype(gram_dtype) != jnp.dtype(jnp.float32)

    kernel = functools.partial(
        _dyn_graph_kernel, scale=scale, n_real=int(N), tn=int(tn),
        approx_recip=bool(approx_recip))

    out_shape = (jax.ShapeDtypeStruct((B, n_pad, n_pad), jnp.float32),
                 jax.ShapeDtypeStruct((B, n_pad, n_pad), jnp.float32))

    grid_spec = pltpu.PrefetchScalarGridSpec(
        num_scalar_prefetch=0,
        grid=grid,
        in_specs=[
            pl.BlockSpec((bt, n_pad, C), lambda b, t: (b, 0, 0)),   # cat(x, hidden)
            pl.BlockSpec((C, Ch), lambda b, t: (0, 0)),             # start_FC weight^T
            pl.BlockSpec((1, Ch), lambda b, t: (0, 0)),             # start_FC bias
            pl.BlockSpec((n_pad, r), lambda b, t: (0, 0)),          # fc[0] weight^T
            pl.BlockSpec((n_pad, r), lambda b, t: (0, 0)),          # fc[2] weight (torch layout)
        ],
        out_specs=[
            pl.BlockSpec((bt, tn, n_pad), lambda b, t: (b, t, 0)),  # norm_adj
            pl.BlockSpec((bt, tn, n_pad), lambda b, t: (b, t, 0)),  # adj
        ],
        scratch_shapes=[pltpu.VMEM((bt, n_pad, Ch), gram_dtype)],   # scaled node features
    )

    norm_adj_p, adj_p = pl.pallas_call(
        kernel,
        out_shape=out_shape,
        grid_spec=grid_spec,
        compiler_params=pltpu.CompilerParams(
            dimension_semantics=("parallel", "arbitrary"),
            vmem_limit_bytes=40 * 1024 * 1024),
    )(cat, w1, b1, wfc1t, wfc2)

    if pad:
        return norm_adj_p[:, :N, :N], adj_p[:, :N, :N]
    return norm_adj_p, adj_p


def _reference(x, hidden, w_start, b_start, w_fc1, w_fc2, *, alpha=3.0):
    """Pure-JAX reference mirroring the PyTorch forward (full f32 precision)."""
    B, N, Cin = x.shape
    hi = jax.lax.Precision.HIGHEST
    nf = (jnp.einsum('bnc,hc->bnh', jnp.concatenate([x, hidden], axis=-1),
                     w_start, precision=hi) + b_start)                 # (B,N,Ch)
    pooled = jnp.mean(nf, axis=-1, keepdims=True)                      # (B,N,1)
    res = jnp.transpose(pooled, (0, 2, 1))                             # (B,1,N)
    res = jnp.maximum(jnp.einsum('bon,rn->bor', res, w_fc1, precision=hi), 0.0)
    res = jax.nn.sigmoid(jnp.einsum('bor,nr->bon', res, w_fc2, precision=hi))
    res = jnp.transpose(res, (0, 2, 1))                                # (B,N,1)
    nf = nf * res
    sim = jnp.einsum('bnc,bmc->bnm', nf, nf, precision=hi) / math.sqrt(float(Cin))
    adj = jnp.maximum(jnp.tanh(alpha * sim), 0.0)
    norm_adj = adj / jnp.sum(adj, axis=-1, keepdims=True)
    return norm_adj, adj


if __name__ == "__main__":
    # Small shapes consistent with the module.
    B, N = 2, 8
    in_channels, hidden_channels, reduction = 4, 32, 16
    r = hidden_channels // reduction
    alpha = 3.0

    key = jax.random.PRNGKey(0)
    k = jax.random.split(key, 6)
    x = jax.random.normal(k[0], (B, N, in_channels), dtype=jnp.float32)
    hidden = jax.random.normal(k[1], (B, N, hidden_channels), dtype=jnp.float32)

    # torch Linear weight layout: [out_features, in_features]
    w_start = 0.1 * jax.random.normal(
        k[2], (hidden_channels, in_channels + hidden_channels), dtype=jnp.float32)
    b_start = 0.1 * jax.random.normal(k[3], (hidden_channels,), dtype=jnp.float32)
    w_fc1 = 0.2 * jax.random.normal(k[4], (r, N), dtype=jnp.float32)
    w_fc2 = 0.2 * jax.random.normal(k[5], (N, r), dtype=jnp.float32)

    ref_norm_adj, ref_adj = _reference(
        x, hidden, w_start, b_start, w_fc1, w_fc2, alpha=alpha)

    # --- exact path (f32 Gram matmul, exact reciprocal) ---------------------
    na32, a32 = dynamic_graph_generate(
        x, hidden, w_start, b_start, w_fc1, w_fc2,
        alpha=alpha, gram_dtype=jnp.float32)
    jax.block_until_ready((na32, a32))
    assert a32.shape == (B, N, N) and na32.shape == (B, N, N)
    assert jnp.allclose(a32, ref_adj, atol=1e-4, rtol=1e-4)
    assert jnp.allclose(na32, ref_norm_adj, atol=1e-4, rtol=1e-4)

    # --- fast path (bf16 Gram matmul on the MXU, approx reciprocal) ---------
    na16, a16 = dynamic_graph_generate(
        x, hidden, w_start, b_start, w_fc1, w_fc2,
        alpha=alpha, gram_dtype=jnp.bfloat16)
    jax.block_until_ready((na16, a16))
    assert jnp.allclose(a16, ref_adj, atol=5e-2, rtol=5e-2)
    assert jnp.allclose(na16, ref_norm_adj, atol=5e-2, rtol=5e-2)

    print("KERNEL_OK")
</pallas_src>

<mosaic_0001>
module attributes {stable_mosaic.version = 11 : i64} {
  func.func @_dyn_graph_kernel(%arg0: i32, %arg1: i32, %arg2: memref<2x128x36xf32, #tpu.memory_space<vmem>>, %arg3: memref<36x32xf32, #tpu.memory_space<vmem>>, %arg4: memref<1x32xf32, #tpu.memory_space<vmem>>, %arg5: memref<128x2xf32, #tpu.memory_space<vmem>>, %arg6: memref<128x2xf32, #tpu.memory_space<vmem>>, %arg7: memref<2x128x128xf32, #tpu.memory_space<vmem>>, %arg8: memref<2x128x128xf32, #tpu.memory_space<vmem>>, %arg9: memref<2x128x32xf32, #tpu.memory_space<vmem>>) attributes {dimension_semantics = [#tpu.dimension_semantics<parallel>, #tpu.dimension_semantics<arbitrary>], iteration_bounds = array<i64: 1, 1>, scalar_prefetch = 0 : i64, scratch_operands = 1 : i64, tpu.core_type = #tpu.core_type<tc>, window_params = [{transform_indices = @transform_0, window_bounds = array<i64: 2, 128, 36>}, {pipeline_mode = #tpu.pipeline_mode<synchronous>, transform_indices = @transform_1, window_bounds = array<i64: 36, 32>}, {pipeline_mode = #tpu.pipeline_mode<synchronous>, transform_indices = @transform_2, window_bounds = array<i64: 1, 32>}, {pipeline_mode = #tpu.pipeline_mode<synchronous>, transform_indices = @transform_3, window_bounds = array<i64: 128, 2>}, {pipeline_mode = #tpu.pipeline_mode<synchronous>, transform_indices = @transform_4, window_bounds = array<i64: 128, 2>}, {transform_indices = @transform_5, window_bounds = array<i64: 2, 128, 128>}, {transform_indices = @transform_6, window_bounds = array<i64: 2, 128, 128>}]} {
    %c0_i32 = arith.constant 0 : i32
    %0 = arith.cmpi eq, %arg1, %c0_i32 : i32
    %1 = arith.extui %0 : i1 to i32
    %c0_i32_0 = arith.constant 0 : i32
    %2 = arith.cmpi ne, %1, %c0_i32_0 : i32
    scf.if %2 {
      %c0_16 = arith.constant 0 : index
      %c0_17 = arith.constant 0 : index
      %c0_18 = arith.constant 0 : index
      %25 = vector.load %arg2[%c0_16, %c0_17, %c0_18] : memref<2x128x36xf32, #tpu.memory_space<vmem>>, vector<2x128x36xf32>
      %26 = vector.shape_cast %25 : vector<2x128x36xf32> to vector<256x36xf32>
      %c0_19 = arith.constant 0 : index
      %c0_20 = arith.constant 0 : index
      %27 = vector.load %arg3[%c0_19, %c0_20] : memref<36x32xf32, #tpu.memory_space<vmem>>, vector<36x32xf32>
      %cst_21 = arith.constant dense<0.000000e+00> : vector<256x32xf32>
      %28 = tpu.matmul %26, %27, %cst_21 {dimension_numbers = #tpu.dot_dimension_numbers<[1], [0], [0], [1], [0, 0, 1, 1], [], []>} : vector<256x36xf32>, vector<36x32xf32>, vector<256x32xf32> -> vector<256x32xf32>
      %c0_22 = arith.constant 0 : index
      %c0_23 = arith.constant 0 : index
      %29 = vector.load %arg4[%c0_22, %c0_23] : memref<1x32xf32, #tpu.memory_space<vmem>>, vector<1x32xf32>
      %30 = vector.broadcast %29 : vector<1x32xf32> to vector<256x32xf32>
      %31 = arith.addf %28, %30 : vector<256x32xf32>
      %32 = vector.shape_cast %31 : vector<256x32xf32> to vector<2x128x32xf32>
      %cst_24 = arith.constant dense<0.000000e+00> : vector<2x128xf32>
      %33 = vector.multi_reduction <add>, %32, %cst_24 [2] : vector<2x128x32xf32> to vector<2x128xf32>
      %34 = vector.shape_cast %33 : vector<2x128xf32> to vector<2x128x1xf32>
      %cst_25 = arith.constant 3.200000e+01 : f32
      %35 = vector.broadcast %cst_25 : f32 to vector<2x128x1xf32>
      %36 = arith.divf %34, %35 : vector<2x128x1xf32>
      %c0_26 = arith.constant 0 : index
      %c0_27 = arith.constant 0 : index
      %37 = vector.load %arg5[%c0_26, %c0_27] : memref<128x2xf32, #tpu.memory_space<vmem>>, vector<128x2xf32>
      %38 = vector.shape_cast %37 : vector<128x2xf32> to vector<1x128x2xf32>
      %39 = vector.broadcast %38 : vector<1x128x2xf32> to vector<2x128x2xf32>
      %40 = vector.broadcast %36 : vector<2x128x1xf32> to vector<2x128x2xf32>
      %41 = arith.mulf %39, %40 : vector<2x128x2xf32>
      %cst_28 = arith.constant dense<0.000000e+00> : vector<2x2xf32>
      %42 = vector.multi_reduction <add>, %41, %cst_28 [1] : vector<2x128x2xf32> to vector<2x2xf32>
      %cst_29 = arith.constant 0.000000e+00 : f32
      %43 = vector.broadcast %cst_29 : f32 to vector<2x2xf32>
      %44 = arith.maximumf %42, %43 : vector<2x2xf32>
      %c0_30 = arith.constant 0 : index
      %c0_31 = arith.constant 0 : index
      %45 = vector.load %arg6[%c0_30, %c0_31] : memref<128x2xf32, #tpu.memory_space<vmem>>, vector<128x2xf32>
      %46 = vector.shape_cast %45 : vector<128x2xf32> to vector<1x128x2xf32>
      %47 = vector.shape_cast %44 : vector<2x2xf32> to vector<2x1x2xf32>
      %48 = vector.broadcast %46 : vector<1x128x2xf32> to vector<2x128x2xf32>
      %49 = vector.broadcast %47 : vector<2x1x2xf32> to vector<2x128x2xf32>
      %50 = arith.mulf %48, %49 : vector<2x128x2xf32>
      %cst_32 = arith.constant dense<0.000000e+00> : vector<2x128xf32>
      %51 = vector.multi_reduction <add>, %50, %cst_32 [2] : vector<2x128x2xf32> to vector<2x128xf32>
      %52 = vector.shape_cast %51 : vector<2x128xf32> to vector<2x128x1xf32>
      %53 = arith.negf %52 : vector<2x128x1xf32>
      %54 = math.exp %53 : vector<2x128x1xf32>
      %cst_33 = arith.constant 1.000000e+00 : f32
      %55 = vector.broadcast %cst_33 : f32 to vector<2x128x1xf32>
      %56 = arith.addf %55, %54 : vector<2x128x1xf32>
      %57 = arith.divf %55, %56 : vector<2x128x1xf32>
      %58 = tpu.iota {dimensions = array<i32: 1>} : vector<1x128x1xi32>
      %c8_i32 = arith.constant 8 : i32
      %59 = vector.broadcast %c8_i32 : i32 to vector<1x128x1xi32>
      %60 = arith.cmpi slt, %58, %59 : vector<1x128x1xi32>
      %cst_34 = arith.constant 0.000000e+00 : f32
      %61 = vector.shape_cast %60 : vector<1x128x1xi1> to vector<1x128x1xi1>
      %62 = vector.broadcast %61 : vector<1x128x1xi1> to vector<2x128x1xi1>
      %63 = vector.broadcast %cst_34 : f32 to vector<2x128x1xf32>
      %64 = arith.select %62, %57, %63 : vector<2x128x1xi1>, vector<2x128x1xf32>
      %65 = vector.broadcast %64 : vector<2x128x1xf32> to vector<2x128x32xf32>
      %66 = arith.mulf %32, %65 : vector<2x128x32xf32>
      %c0_35 = arith.constant 0 : index
      %c0_36 = arith.constant 0 : index
      %c0_37 = arith.constant 0 : index
      %67 = vector.load %arg9[%c0_35, %c0_36, %c0_37] : memref<2x128x32xf32, #tpu.memory_space<vmem>>, vector<2x128x32xf32>
      tpu.vector_store %arg9[%c0_35, %c0_36, %c0_37], %66 {strides = array<i32>} : memref<2x128x32xf32, #tpu.memory_space<vmem>>, vector<2x128x32xf32>,
    } else {
    }
    %c128_i32 = arith.constant 128 : i32
    %3 = arith.muli %arg1, %c128_i32 : i32
    %4 = tpu.assume_multiple %3, 128 : i32
    %c0 = arith.constant 0 : index
    %5 = arith.index_cast %4 : i32 to index
    %c0_1 = arith.constant 0 : index
    %6 = vector.load %arg9[%c0, %5, %c0_1] : memref<2x128x32xf32, #tpu.memory_space<vmem>>, vector<2x128x32xf32>
    %c0_2 = arith.constant 0 : index
    %c0_3 = arith.constant 0 : index
    %c0_4 = arith.constant 0 : index
    %7 = vector.load %arg9[%c0_2, %c0_3, %c0_4] : memref<2x128x32xf32, #tpu.memory_space<vmem>>, vector<2x128x32xf32>
    %cst = arith.constant dense<0.000000e+00> : vector<2x128x128xf32>
    %8 = tpu.matmul %6, %7, %cst {dimension_numbers = #tpu.dot_dimension_numbers<[2], [2], [1], [1], [0, 0, 0, 1, 1, 1], [0], [0]>} : vector<2x128x32xf32>, vector<2x128x32xf32>, vector<2x128x128xf32> -> vector<2x128x128xf32>
    %cst_5 = arith.constant 1.500000e+00 : f32
    %9 = vector.broadcast %cst_5 : f32 to vector<2x128x128xf32>
    %10 = arith.mulf %8, %9 : vector<2x128x128xf32>
    %11 = math.tanh %10 : vector<2x128x128xf32>
    %cst_6 = arith.constant 0.000000e+00 : f32
    %12 = vector.broadcast %cst_6 : f32 to vector<2x128x128xf32>
    %13 = arith.maximumf %11, %12 : vector<2x128x128xf32>
    %cst_7 = arith.constant dense<0.000000e+00> : vector<2x128xf32>
    %14 = vector.multi_reduction <add>, %13, %cst_7 [2] : vector<2x128x128xf32> to vector<2x128xf32>
    %15 = vector.shape_cast %14 : vector<2x128xf32> to vector<2x128x1xf32>
    %cst_8 = arith.constant 0.000000e+00 : f32
    %16 = vector.broadcast %cst_8 : f32 to vector<2x128x1xf32>
    %17 = arith.cmpf ogt, %15, %16 : vector<2x128x1xf32>
    %cst_9 = arith.constant 1.000000e+00 : f32
    %18 = vector.broadcast %cst_9 : f32 to vector<2x128x1xf32>
    %19 = arith.select %17, %15, %18 : vector<2x128x1xi1>, vector<2x128x1xf32>
    %20 = tpu.reciprocal %19 : vector<2x128x1xf32> -> vector<2x128x1xf32>
    %c0_10 = arith.constant 0 : index
    %c0_11 = arith.constant 0 : index
    %c0_12 = arith.constant 0 : index
    %21 = vector.load %arg8[%c0_10, %c0_11, %c0_12] : memref<2x128x128xf32, #tpu.memory_space<vmem>>, vector<2x128x128xf32>
    tpu.vector_store %arg8[%c0_10, %c0_11, %c0_12], %13 {strides = array<i32>} : memref<2x128x128xf32, #tpu.memory_space<vmem>>, vector<2x128x128xf32>,
    %22 = vector.broadcast %20 : vector<2x128x1xf32> to vector<2x128x128xf32>
    %23 = arith.mulf %13, %22 : vector<2x128x128xf32>
    %c0_13 = arith.constant 0 : index
    %c0_14 = arith.constant 0 : index
    %c0_15 = arith.constant 0 : index
    %24 = vector.load %arg7[%c0_13, %c0_14, %c0_15] : memref<2x128x128xf32, #tpu.memory_space<vmem>>, vector<2x128x128xf32>
    tpu.vector_store %arg7[%c0_13, %c0_14, %c0_15], %23 {strides = array<i32>} : memref<2x128x128xf32, #tpu.memory_space<vmem>>, vector<2x128x128xf32>,
    return
  }
  func.func @transform_0(%arg0: i32, %arg1: i32) -> (i32, i32, i32) {
    %c0_i32 = arith.constant 0 : i32
    %c0_i32_0 = arith.constant 0 : i32
    %c0_i32_1 = arith.constant 0 : i32
    return %arg0, %c0_i32, %c0_i32_0 : i32, i32, i32
  }
  func.func @transform_1(%arg0: i32, %arg1: i32) -> (i32, i32) {
    %c0_i32 = arith.constant 0 : i32
    %c0_i32_0 = arith.constant 0 : i32
    %c0_i32_1 = arith.constant 0 : i32
    return %c0_i32, %c0_i32_0 : i32, i32
  }
  func.func @transform_2(%arg0: i32, %arg1: i32) -> (i32, i32) {
    %c0_i32 = arith.constant 0 : i32
    %c0_i32_0 = arith.constant 0 : i32
    %c0_i32_1 = arith.constant 0 : i32
    return %c0_i32, %c0_i32_0 : i32, i32
  }
  func.func @transform_3(%arg0: i32, %arg1: i32) -> (i32, i32) {
    %c0_i32 = arith.constant 0 : i32
    %c0_i32_0 = arith.constant 0 : i32
    %c0_i32_1 = arith.constant 0 : i32
    return %c0_i32, %c0_i32_0 : i32, i32
  }
  func.func @transform_4(%arg0: i32, %arg1: i32) -> (i32, i32) {
    %c0_i32 = arith.constant 0 : i32
    %c0_i32_0 = arith.constant 0 : i32
    %c0_i32_1 = arith.constant 0 : i32
    return %c0_i32, %c0_i32_0 : i32, i32
  }
  func.func @transform_5(%arg0: i32, %arg1: i32) -> (i32, i32, i32) {
    %c0_i32 = arith.constant 0 : i32
    %c0_i32_0 = arith.constant 0 : i32
    return %arg0, %arg1, %c0_i32 : i32, i32, i32
  }
  func.func @transform_6(%arg0: i32, %arg1: i32) -> (i32, i32, i32) {
    %c0_i32 = arith.constant 0 : i32
    %c0_i32_0 = arith.constant 0 : i32
    return %arg0, %arg1, %c0_i32 : i32, i32, i32
  }
}

</mosaic_0001>

<bundles_post_ra>
// kernel: tpu_custom_call.1
= control target key start
LH: loop header
LB: loop body
LE: loop exit
PB: predicated region body
PF: predicated region fallthrough
CT: control target
= control target key end

     0   :  { %12 = vsyncpa [#allocation4], 0  ;;  %vm169_vm0 = vcmask 1043456   ;;  %vm72_vm1 = vcmask 293888   ;;  %s3562_s0 = inlined_call_operand.vmem [shape: f32[2,128,36], index: 0, kind: input, shape index: {}]   ;;  %s3563_s1 = inlined_call_operand.vmem [shape: f32[36,32], index: 1, kind: input, shape index: {}]   ;;  %s3564_s2 = inlined_call_operand.vmem [shape: f32[1,32], index: 2, kind: input, shape index: {}]   ;;  %s3565_s3 = inlined_call_operand.vmem [shape: f32[128,2], index: 3, kind: input, shape index: {}]   ;;  %s3566_s4 = inlined_call_operand.vmem [shape: f32[128,2], index: 4, kind: input, shape index: {}]   ;;  %s3567_s5 = inlined_call_operand.hbm [shape: f32[2,128,128], index: 5, kind: output, shape index: {0}]   ;;  %s3568_s6 = inlined_call_operand.hbm [shape: f32[2,128,128], index: 6, kind: output, shape index: {1}]  }
   0x1   :  { %v64_v0 = vld [vmem:[%s3563_s1 + $0x20] sm:$0xf]  ;;  %v63_v1 = vld [vmem:[%s3563_s1 + $0x18] sm:$0xff]  ;;  %v62_v3 = vld [vmem:[%s3563_s1 + $0x10] sm:$0xff] }
   0x2   :  { %2314 = vmatprep.subr.msk.mxu0 %vm169_vm0, %v64_v0  ;;  %v28_v2 = vld [vmem:[%s3562_s0] sm:$0xff]  ;;  %v61_v4 = vld [vmem:[%s3563_s1 + $0x8] sm:$0xff]  ;;  %v30_v7 = vld [vmem:[%s3562_s0 + $0x10] sm:$0xff] }
   0x3   :  { %2315 = vmatpush3.msk.msra.mxu0 %vm169_vm0, %v64_v0  ;;  %2324 = vmatprep.mubr.msk.f32.mxu0 %vm72_vm1, %v28_v2  ;;  %v60_v5 = vld [vmem:[%s3563_s1] sm:$0xff]  ;;  %v29_v6 = vld [vmem:[%s3562_s0 + $0x8] sm:$0xff]  ;;  %v31_v8 = vld [vmem:[%s3562_s0 + $0x18] sm:$0xff] }
   0x4   :  { %2316 = vmatprep.subr.mxu0 %v63_v1 }
   0x5   :  { %2317 = vmatpush3.msra.mxu0 %v63_v1 }
   0x6   :  { %2318 = vmatprep.subr.mxu0 %v62_v3 }
   0x7   :  { %2319 = vmatpush3.msra.mxu0 %v62_v3 }
   0x8   :  { %2320 = vmatprep.subr.mxu0 %v61_v4 }
   0x9   :  { %2321 = vmatpush3.msra.mxu0 %v61_v4 }
   0xa   :  { %2322 = vmatprep.subr.mxu0 %v60_v5 }
   0xb   :  { %2323 = vmatpush3.msra.mxu0 %v60_v5 }
   0xc   :  { %2325 = vmatmul.mubr.msk.f32.vlgmr.msra.gmra.mxu0 %vm72_vm1, %v29_v6 }
   0xd   :  { %2327 = vmatprep.mubr.msk.f32.mxu0 %vm72_vm1, %v30_v7 }
   0xe   :  { %13 = vsyncpa [#allocation6], 0  ;;  %v32_v9 = vld [vmem:[%s3562_s0 + $0x20] sm:$0xff]  ;;  %v33_v10 = vld [vmem:[%s3562_s0 + $0x28] sm:$0xff]  ;;  %vm398_vm2 = vcmask 261120   ;;  %vm576_vm3 = vcmask 15360  }
   0xf   :  { %v34_v11 = vld [vmem:[%s3562_s0 + $0x30] sm:$0xff]  ;;  %v35_v12 = vld [vmem:[%s3562_s0 + $0x38] sm:$0xff]  ;;  %v36_v13 = vld [vmem:[%s3562_s0 + $0x40] sm:$0xff] }
  0x10   :  { %2328 = vmatmul.mubr.msk.f32.gmra.mxu0 %vm72_vm1, %v31_v8  ;;  %v37_v14 = vld [vmem:[%s3562_s0 + $0x48] sm:$0xff]  ;;  %v38_v15 = vld [vmem:[%s3562_s0 + $0x50] sm:$0xff]  ;;  %v39_v16 = vld [vmem:[%s3562_s0 + $0x58] sm:$0xff] }
  0x11   :  { %2330 = vmatprep.mubr.msk.f32.mxu0 %vm72_vm1, %v32_v9  ;;  %v40_v17 = vld [vmem:[%s3562_s0 + $0x60] sm:$0xff]  ;;  %v41_v18 = vld [vmem:[%s3562_s0 + $0x68] sm:$0xff]  ;;  %v42_v19 = vld [vmem:[%s3562_s0 + $0x70] sm:$0xff] }
  0x12   :  { %v43_v20 = vld [vmem:[%s3562_s0 + $0x78] sm:$0xff]  ;;  %v44_v21 = vld [vmem:[%s3562_s0 + $0x80] sm:$0xff]  ;;  %v45_v22 = vld [vmem:[%s3562_s0 + $0x88] sm:$0xff] }
  0x13   :  { %v46_v23 = vld [vmem:[%s3562_s0 + $0x90] sm:$0xff]  ;;  %v47_v24 = vld [vmem:[%s3562_s0 + $0x98] sm:$0xff]  ;;  %v48_v25 = vld [vmem:[%s3562_s0 + $0xa0] sm:$0xff] }
  0x14   :  { %2331 = vmatmul.mubr.msk.f32.gmra.mxu0 %vm72_vm1, %v33_v10  ;;  %v49_v26 = vld [vmem:[%s3562_s0 + $0xa8] sm:$0xff]  ;;  %v50_v27 = vld [vmem:[%s3562_s0 + $0xb0] sm:$0xff]  ;;  %v51_v28 = vld [vmem:[%s3562_s0 + $0xb8] sm:$0xff] }
  0x15   :  { %2333 = vmatprep.mubr.msk.f32.mxu0 %vm72_vm1, %v34_v11  ;;  %v52_v29 = vld [vmem:[%s3562_s0 + $0xc0] sm:$0xff]  ;;  %v53_v30 = vld [vmem:[%s3562_s0 + $0xc8] sm:$0xff]  ;;  %v54_v31 = vld [vmem:[%s3562_s0 + $0xd0] sm:$0xff] }
  0x16   :  { %v55_v32 = vld [vmem:[%s3562_s0 + $0xd8] sm:$0xff]  ;;  %v56_v33 = vld [vmem:[%s3562_s0 + $0xe0] sm:$0xff]  ;;  %v57_v34 = vld [vmem:[%s3562_s0 + $0xe8] sm:$0xff] }
  0x17   :  { %v58_v35 = vld [vmem:[%s3562_s0 + $0xf0] sm:$0xff]  ;;  %v59_v36 = vld [vmem:[%s3562_s0 + $0xf8] sm:$0xff]  ;;  %v2853_v37 = vld [vmem:[%s3564_s2] ss:$0 sm:$0xff] }
  0x18   :  { %2334 = vmatmul.mubr.msk.f32.gmra.mxu0 %vm72_vm1, %v35_v12 }
  0x19   :  { %2336 = vmatprep.mubr.msk.f32.mxu0 %vm72_vm1, %v36_v13 }
  0x1c   :  { %2337 = vmatmul.mubr.msk.f32.gmra.mxu0 %vm72_vm1, %v37_v14 }
  0x1d   :  { %2339 = vmatprep.mubr.msk.f32.mxu0 %vm72_vm1, %v38_v15 }
  0x20   :  { %2340 = vmatmul.mubr.msk.f32.gmra.mxu0 %vm72_vm1, %v39_v16 }
  0x21   :  { %2342 = vmatprep.mubr.msk.f32.mxu0 %vm72_vm1, %v40_v17 }
  0x24   :  { %2343 = vmatmul.mubr.msk.f32.gmra.mxu0 %vm72_vm1, %v41_v18 }
  0x25   :  { %2345 = vmatprep.mubr.msk.f32.mxu0 %vm72_vm1, %v42_v19 }
  0x28   :  { %2346 = vmatmul.mubr.msk.f32.gmra.mxu0 %vm72_vm1, %v43_v20 }
  0x29   :  { %2348 = vmatprep.mubr.msk.f32.mxu0 %vm72_vm1, %v44_v21 }
  0x2c   :  { %2349 = vmatmul.mubr.msk.f32.gmra.mxu0 %vm72_vm1, %v45_v22 }
  0x2d   :  { %2351 = vmatprep.mubr.msk.f32.mxu0 %vm72_vm1, %v46_v23 }
  0x30   :  { %2352 = vmatmul.mubr.msk.f32.gmra.mxu0 %vm72_vm1, %v47_v24 }
  0x31   :  { %2354 = vmatprep.mubr.msk.f32.mxu0 %vm72_vm1, %v48_v25 }
  0x34   :  { %2355 = vmatmul.mubr.msk.f32.gmra.mxu0 %vm72_vm1, %v49_v26 }
  0x35   :  { %2357 = vmatprep.mubr.msk.f32.mxu0 %vm72_vm1, %v50_v27 }
  0x38   :  { %2358 = vmatmul.mubr.msk.f32.gmra.mxu0 %vm72_vm1, %v51_v28 }
  0x39   :  { %2360 = vmatprep.mubr.msk.f32.mxu0 %vm72_vm1, %v52_v29 }
  0x3c   :  { %2361 = vmatmul.mubr.msk.f32.gmra.mxu0 %vm72_vm1, %v53_v30 }
  0x3d   :  { %2363 = vmatprep.mubr.msk.f32.mxu0 %vm72_vm1, %v54_v31 }
  0x40   :  { %2364 = vmatmul.mubr.msk.f32.gmra.mxu0 %vm72_vm1, %v55_v32 }
  0x41   :  { %2366 = vmatprep.mubr.msk.f32.mxu0 %vm72_vm1, %v56_v33 }
  0x44   :  { %2367 = vmatmul.mubr.msk.f32.gmra.mxu0 %vm72_vm1, %v57_v34 }
  0x45   :  { %2369 = vmatprep.mubr.msk.f32.mxu0 %vm72_vm1, %v58_v35 }
  0x48   :  { %2370 = vmatmul.mubr.msk.f32.gmra.mxu0 %vm72_vm1, %v59_v36 }
  0xcc   :  { %v2326_v38 = vpop.f32.mrf.mxu0 }
  0xcd   :  { %v245_v39 = vadd.f32 %v2326_v38, %v2853_v37 }
  0xce   :  { %v239_v40 = vpop.f32.mrf.mxu0 }
  0xcf   :  { %v1087_v41 = vmul.f32 0.0, %v245_v39  ;;  %v2857_v42 = vadd.f32 %v2853_v37, %v239_v40  ;;  %v402_v43 = vsel %vm398_vm2, %v245_v39, 0.0 }
  0xd0   :  { %403 = vadd.xlane.f32.xlu0 %v402_v43  ;;  %v2329_v44 = vpop.f32.mrf.mxu0 }
  0xd1   :  { %1119 = vst.msk [vmem:[#allocation2 + $0x8] sm:$0xff] %vm398_vm2, %v1087_v41  ;;  %v255_v45 = vadd.f32 %v2329_v44, %v2853_v37  ;;  %v399_v49 = vsel %vm398_vm2, %v2857_v42, 0.0 }
  0xd2   :  { %v249_v46 = vpop.f32.mrf.mxu0 }
  0xd3   :  { %v1089_v47 = vmul.f32 0.0, %v255_v45  ;;  %v250_v48 = vadd.f32 %v2853_v37, %v249_v46  ;;  %v408_v56 = vsel %vm398_vm2, %v255_v45, 0.0 }
  0xd4   :  { %v2332_v50 = vpop.f32.mrf.mxu0  ;;  %400 = vadd.xlane.f32.xlu0 %v399_v49 }
  0xd5   :  { %1121 = vst.msk [vmem:[#allocation2 + $0x18] sm:$0xff] %vm398_vm2, %v1089_v47  ;;  %v1088_v51 = vmul.f32 0.0, %v250_v48  ;;  %v265_v52 = vadd.f32 %v2332_v50, %v2853_v37  ;;  %v405_v63 = vsel %vm398_vm2, %v250_v48, 0.0 }
  0xd6   :  { %v259_v53 = vpop.f32.mrf.mxu0 }
  0xd7   :  { %1120 = vst.msk [vmem:[#allocation2 + $0x10] sm:$0xff] %vm398_vm2, %v1088_v51  ;;  %v1091_v54 = vmul.f32 0.0, %v265_v52  ;;  %v260_v55 = vadd.f32 %v2853_v37, %v259_v53  ;;  %v414_v6 = vsel %vm398_vm2, %v265_v52, 0.0 }
  0xd8   :  { %v2335_v57 = vpop.f32.mrf.mxu0  ;;  %409 = vadd.xlane.f32.xlu0 %v408_v56 }
  0xd9   :  { %1123 = vst.msk [vmem:[#allocation2 + $0x28] sm:$0xff] %vm398_vm2, %v1091_v54  ;;  %v1090_v58 = vmul.f32 0.0, %v260_v55  ;;  %v275_v59 = vadd.f32 %v2335_v57, %v2853_v37  ;;  %v411_v13 = vsel %vm398_vm2, %v260_v55, 0.0 }
  0xda   :  { %v269_v60 = vpop.f32.mrf.mxu0 }
  0xdb   :  { %1122 = vst.msk [vmem:[#allocation2 + $0x20] sm:$0xff] %vm398_vm2, %v1090_v58  ;;  %v1093_v61 = vmul.f32 0.0, %v275_v59  ;;  %v270_v62 = vadd.f32 %v2853_v37, %v269_v60  ;;  %v420_v20 = vsel %vm398_vm2, %v275_v59, 0.0 }
  0xdc   :  { %v2338_v0 = vpop.f32.mrf.mxu0  ;;  %406 = vadd.xlane.f32.xlu0 %v405_v63 }
  0xdd   :  { %1125 = vst.msk [vmem:[#allocation2 + $0x38] sm:$0xff] %vm398_vm2, %v1093_v61  ;;  %v1092_v1 = vmul.f32 0.0, %v270_v62  ;;  %v285_v2 = vadd.f32 %v2338_v0, %v2853_v37  ;;  %v417_v27 = vsel %vm398_vm2, %v270_v62, 0.0 }
  0xde   :  { %v279_v3 = vpop.f32.mrf.mxu0 }
  0xdf   :  { %1124 = vst.msk [vmem:[#allocation2 + $0x30] sm:$0xff] %vm398_vm2, %v1092_v1  ;;  %v1095_v4 = vmul.f32 0.0, %v285_v2  ;;  %v280_v5 = vadd.f32 %v2853_v37, %v279_v3  ;;  %v426_v35 = vsel %vm398_vm2, %v285_v2, 0.0 }
  0xe0   :  { %v2341_v7 = vpop.f32.mrf.mxu0  ;;  %415 = vadd.xlane.f32.xlu0 %v414_v6 }
  0xe1   :  { %1127 = vst.msk [vmem:[#allocation2 + $0x48] sm:$0xff] %vm398_vm2, %v1095_v4  ;;  %v1094_v8 = vmul.f32 0.0, %v280_v5  ;;  %v2882_v9 = vadd.f32 %v2341_v7, %v2853_v37  ;;  %v423_v44 = vsel %vm398_vm2, %v280_v5, 0.0 }
  0xe2   :  { %v289_v10 = vpop.f32.mrf.mxu0 }
  0xe3   :  { %1126 = vst.msk [vmem:[#allocation2 + $0x40] sm:$0xff] %vm398_vm2, %v1094_v8  ;;  %v1097_v11 = vmul.f32 0.0, %v2882_v9  ;;  %v2887_v12 = vadd.f32 %v2853_v37, %v289_v10  ;;  %v432_v54 = vsel %vm398_vm2, %v2882_v9, 0.0 }
  0xe4   :  { %v2344_v14 = vpop.f32.mrf.mxu0  ;;  %412 = vadd.xlane.f32.xlu0 %v411_v13 }
  0xe5   :  { %1129 = vst.msk [vmem:[#allocation2 + $0x58] sm:$0xff] %vm398_vm2, %v1097_v11  ;;  %v1096_v15 = vmul.f32 0.0, %v2887_v12  ;;  %v2893_v16 = vadd.f32 %v2344_v14, %v2853_v37  ;;  %v429_v63 = vsel %vm398_vm2, %v2887_v12, 0.0 }
  0xe6   :  { %v299_v17 = vpop.f32.mrf.mxu0 }
  0xe7   :  { %1128 = vst.msk [vmem:[#allocation2 + $0x50] sm:$0xff] %vm398_vm2, %v1096_v15  ;;  %v1099_v18 = vmul.f32 0.0, %v2893_v16  ;;  %v2898_v19 = vadd.f32 %v2853_v37, %v299_v17  ;;  %v438_v8 = vsel %vm398_vm2, %v2893_v16, 0.0 }
  0xe8   :  { %v2347_v21 = vpop.f32.mrf.mxu0  ;;  %421 = vadd.xlane.f32.xlu0 %v420_v20 }
  0xe9   :  { %1131 = vst.msk [vmem:[#allocation2 + $0x68] sm:$0xff] %vm398_vm2, %v1099_v18  ;;  %v1098_v22 = vmul.f32 0.0, %v2898_v19  ;;  %v2904_v23 = vadd.f32 %v2347_v21, %v2853_v37  ;;  %v435_v17 = vsel %vm398_vm2, %v2898_v19, 0.0 }
  0xea   :  { %v309_v24 = vpop.f32.mrf.mxu0 }
  0xeb   :  { %1130 = vst.msk [vmem:[#allocation2 + $0x60] sm:$0xff] %vm398_vm2, %v1098_v22  ;;  %v1101_v25 = vmul.f32 0.0, %v2904_v23  ;;  %v2909_v26 = vadd.f32 %v2853_v37, %v309_v24 }
  0xec   :  { %v2350_v28 = vpop.f32.mrf.mxu0  ;;  %418 = vadd.xlane.f32.xlu0 %v417_v27  ;;  %v2974_v13 = vld [vmem:[#allocation2 + $0x58] sm:$0xff] }
  0xed   :  { %1133 = vst.msk [vmem:[#allocation2 + $0x78] sm:$0xff] %vm398_vm2, %v1101_v25  ;;  %v1100_v29 = vmul.f32 0.0, %v2909_v26  ;;  %v325_v30 = vadd.f32 %v2350_v28, %v2853_v37  ;;  %v441_v28 = vsel %vm398_vm2, %v2909_v26, 0.0 }
  0xee   :  { %v319_v31 = vpop.f32.mrf.mxu0  ;;  %v2991_v25 = vld [vmem:[#allocation2 + $0x50] sm:$0xff] }
  0xef   :  { %1132 = vst.msk [vmem:[#allocation2 + $0x70] sm:$0xff] %vm398_vm2, %v1100_v29  ;;  %v1103_v32 = vmul.f32 0.0, %v325_v30  ;;  %v2917_v33 = vadd.f32 %v2853_v37, %v319_v31  ;;  %v450_v34 = vsel %vm398_vm2, %v325_v30, 0.0 }
  0xf0   :  { %451 = vadd.xlane.f32.xlu1 %v450_v34  ;;  %v2353_v36 = vpop.f32.mrf.mxu0  ;;  %427 = vadd.xlane.f32.xlu0 %v426_v35  ;;  %v2948_v59 = vld [vmem:[#allocation2 + $0x68] sm:$0xff] }
  0xf1   :  { %1135 = vst.msk [vmem:[#allocation2 + $0x88] sm:$0xff] %vm398_vm2, %v1103_v32  ;;  %v335_v38 = vadd.f32 %v2353_v36, %v2853_v37  ;;  %v447_v43 = vsel %vm398_vm2, %v2917_v33, 0.0  ;;  %v3008_v32 = vld [vmem:[#allocation2 + $0x48] sm:$0xff] }
  0xf2   :  { %v329_v39 = vpop.f32.mrf.mxu0  ;;  %v2962_v5 = vld [vmem:[#allocation2 + $0x60] sm:$0xff] }
  0xf3   :  { %v1105_v40 = vmul.f32 0.0, %v335_v38  ;;  %v330_v41 = vadd.f32 %v2853_v37, %v329_v39  ;;  %v456_v49 = vsel %vm398_vm2, %v335_v38, 0.0  ;;  %v444_v38 = vsel %vm398_vm2, %v2904_v23, 0.0 }
  0xf4   :  { %v2356_v45 = vpop.f32.mrf.mxu0  ;;  %448 = vadd.xlane.f32.xlu1 %v447_v43  ;;  %424 = vadd.xlane.f32.xlu0 %v423_v44  ;;  %v2927_v46 = vld [vmem:[#allocation2 + $0x78] sm:$0xff] }
  0xf5   :  { %1137 = vst.msk [vmem:[#allocation2 + $0x98] sm:$0xff] %vm398_vm2, %v1105_v40  ;;  %v1104_v47 = vmul.f32 0.0, %v330_v41  ;;  %v345_v48 = vadd.f32 %v2356_v45, %v2853_v37  ;;  %2372 = vmatprep.subr.msk.mxu1 %vm398_vm2, %v2927_v46  ;;  %v453_v62 = vsel %vm398_vm2, %v330_v41, 0.0  ;;  %v3022_v41 = vld [vmem:[#allocation2 + $0x40] sm:$0xff]  ;;  %v3043_v45 = vld [vmem:[#allocation2 + $0x30] sm:$0xff] }
  0xf6   :  { %v339_v50 = vpop.f32.mrf.mxu0  ;;  %2373 = vmatpush3.xpose.msk.msra.mxu1 %vm398_vm2, %v2927_v46  ;;  %v2936_v51 = vld [vmem:[#allocation2 + $0x70] sm:$0xff] }
  0xf7   :  { %1136 = vst.msk [vmem:[#allocation2 + $0x90] sm:$0xff] %vm398_vm2, %v1104_v47  ;;  %v1107_v52 = vmul.f32 0.0, %v345_v48  ;;  %v340_v53 = vadd.f32 %v2853_v37, %v339_v50  ;;  %2374 = vmatprep.subr.msk.mxu1 %vm398_vm2, %v2936_v51  ;;  %v462_v3 = vsel %vm398_vm2, %v345_v48, 0.0 }
  0xf8   :  { %v2359_v55 = vpop.f32.mrf.mxu0  ;;  %457 = vadd.xlane.f32.xlu1 %v456_v49  ;;  %433 = vadd.xlane.f32.xlu0 %v432_v54  ;;  %v3057_v49 = vld [vmem:[#allocation2 + $0x28] sm:$0xff]  ;;  %v3072_v54 = vld [vmem:[#allocation2 + $0x20] sm:$0xff] }
  0xf9   :  { %1139 = vst.msk [vmem:[#allocation2 + $0xa8] sm:$0xff] %vm398_vm2, %v1107_v52  ;;  %v1106_v56 = vmul.f32 0.0, %v340_v53  ;;  %v355_v57 = vadd.f32 %v2359_v55, %v2853_v37  ;;  %v459_v16 = vsel %vm398_vm2, %v340_v53, 0.0  ;;  %v3082_v55 = vld [vmem:[#allocation2 + $0x18] sm:$0xff] }
  0xfa   :  { %v349_v58 = vpop.f32.mrf.mxu0  ;;  %2375 = vmatpush3.xpose.msk.msra.mxu1 %vm398_vm2, %v2936_v51 }
  0xfb   :  { %1138 = vst.msk [vmem:[#allocation2 + $0xa0] sm:$0xff] %vm398_vm2, %v1106_v56  ;;  %v1109_v60 = vmul.f32 0.0, %v355_v57  ;;  %v350_v61 = vadd.f32 %v2853_v37, %v349_v58  ;;  %2376 = vmatprep.subr.msk.mxu1 %vm398_vm2, %v2948_v59  ;;  %v468_v22 = vsel %vm398_vm2, %v355_v57, 0.0  ;;  %v3096_v58 = vld [vmem:[#allocation2 + $0x10] sm:$0xff] }
  0xfc   :  { %v2362_v0 = vpop.f32.mrf.mxu0  ;;  %454 = vadd.xlane.f32.xlu1 %v453_v62  ;;  %430 = vadd.xlane.f32.xlu0 %v429_v63  ;;  %v3109_v62 = vld [vmem:[#allocation2 + $0x8] sm:$0xff] }
  0xfd   :  { %1141 = vst.msk [vmem:[#allocation2 + $0xb8] sm:$0xff] %vm398_vm2, %v1109_v60  ;;  %v1108_v1 = vmul.f32 0.0, %v350_v61  ;;  %v365_v2 = vadd.f32 %v2362_v0, %v2853_v37  ;;  %v465_v36 = vsel %vm398_vm2, %v350_v61, 0.0 }
  0xfe   :  { %v359_v4 = vpop.f32.mrf.mxu0  ;;  %2377 = vmatpush3.xpose.msk.msra.mxu1 %vm398_vm2, %v2948_v59 }
  0xff   :  { %1140 = vst.msk [vmem:[#allocation2 + $0xb0] sm:$0xff] %vm398_vm2, %v1108_v1  ;;  %v1111_v6 = vmul.f32 0.0, %v365_v2  ;;  %v360_v7 = vadd.f32 %v2853_v37, %v359_v4  ;;  %2378 = vmatprep.subr.msk.mxu1 %vm398_vm2, %v2962_v5  ;;  %v474_v40 = vsel %vm398_vm2, %v365_v2, 0.0 }
 0x100   :  { %v2365_v9 = vpop.f32.mrf.mxu0  ;;  %463 = vadd.xlane.f32.xlu1 %v462_v3  ;;  %439 = vadd.xlane.f32.xlu0 %v438_v8  ;;  %v3141_v4 = vld [vmem:[#allocation2 + $0xa8] sm:$0xff]  ;;  %v3159_v8 = vld [vmem:[#allocation2 + $0x90] sm:$0xff] }
 0x101   :  { %1143 = vst.msk [vmem:[#allocation2 + $0xc8] sm:$0xff] %vm398_vm2, %v1111_v6  ;;  %v1110_v10 = vmul.f32 0.0, %v360_v7  ;;  %v375_v11 = vadd.f32 %v2365_v9, %v2853_v37  ;;  %v471_v23 = vsel %vm398_vm2, %v360_v7, 0.0  ;;  %v3153_v7 = vld [vmem:[#allocation2 + $0x98] sm:$0xff]  ;;  %v3165_v9 = vld [vmem:[#allocation2 + $0x88] sm:$0xff] }
 0x102   :  { %v369_v12 = vpop.f32.mrf.mxu0  ;;  %2379 = vmatpush3.xpose.msk.msra.mxu1 %vm398_vm2, %v2962_v5  ;;  %v3147_v6 = vld [vmem:[#allocation2 + $0xa0] sm:$0xff] }
 0x103   :  { %1142 = vst.msk [vmem:[#allocation2 + $0xc0] sm:$0xff] %vm398_vm2, %v1110_v10  ;;  %v1113_v14 = vmul.f32 0.0, %v375_v11  ;;  %v2978_v15 = vadd.f32 %v2853_v37, %v369_v12  ;;  %2380 = vmatprep.subr.msk.mxu1 %vm398_vm2, %v2974_v13  ;;  %v480_v44 = vsel %vm398_vm2, %v375_v11, 0.0 }
 0x104   :  { %v2368_v18 = vpop.f32.mrf.mxu0  ;;  %460 = vadd.xlane.f32.xlu1 %v459_v16  ;;  %436 = vadd.xlane.f32.xlu0 %v435_v17  ;;  %v3129_v2 = vld [vmem:[#allocation2 + $0xb8] sm:$0xff]  ;;  %v3174_v16 = vld [vmem:[%s3565_s3] sm:$0xff] }
 0x105   :  { %1145 = vst.msk [vmem:[#allocation2 + $0xd8] sm:$0xff] %vm398_vm2, %v1113_v14  ;;  %v1112_v20 = vmul.f32 0.0, %v2978_v15  ;;  %v385_v21 = vadd.f32 %v2368_v18, %v2853_v37  ;;  %v477_v50 = vsel %vm398_vm2, %v2978_v15, 0.0 }
 0x106   :  { %v379_v24 = vpop.f32.mrf.mxu0  ;;  %2381 = vmatpush3.xpose.msk.msra.mxu1 %vm398_vm2, %v2974_v13  ;;  %v3135_v3 = vld [vmem:[#allocation2 + $0xb0] sm:$0xff] }
 0x107   :  { %1144 = vst.msk [vmem:[#allocation2 + $0xd0] sm:$0xff] %vm398_vm2, %v1112_v20  ;;  %v1115_v19 = vmul.f32 0.0, %v385_v21  ;;  %v2995_v27 = vadd.f32 %v2853_v37, %v379_v24  ;;  %2382 = vmatprep.subr.msk.mxu1 %vm398_vm2, %v2991_v25  ;;  %v486_v53 = vsel %vm398_vm2, %v385_v21, 0.0  ;;  %v3179_v21 = vld [vmem:[%s3565_s3 + $0x8] sm:$0xff] }
 0x108   :  { %v2371_v29 = vpop.f32.mrf.mxu0  ;;  %469 = vadd.xlane.f32.xlu1 %v468_v22  ;;  %442 = vadd.xlane.f32.xlu0 %v441_v28  ;;  %v3111_v63 = vld [vmem:[#allocation2 + $0xc8] sm:$0xff]  ;;  %v3184_v22 = vld [vmem:[%s3565_s3 + $0x10] sm:$0xff] }
 0x109   :  { %1147 = vst.msk [vmem:[#allocation2 + $0xe8] sm:$0xff] %vm398_vm2, %v1115_v19  ;;  %v1114_v30 = vmul.f32 0.0, %v2995_v27  ;;  %v3004_v31 = vadd.f32 %v2371_v29, %v2853_v37  ;;  %v483_v57 = vsel %vm398_vm2, %v2995_v27, 0.0 }
 0x10a   :  { %2383 = vmatpush3.xpose.msk.msra.mxu1 %vm398_vm2, %v2991_v25  ;;  %v389_v34 = vpop.f32.mrf.mxu0  ;;  %v3123_v1 = vld [vmem:[#allocation2 + $0xc0] sm:$0xff] }
 0x10b   :  { %1146 = vst.msk [vmem:[#allocation2 + $0xe0] sm:$0xff] %vm398_vm2, %v1114_v30  ;;  %v1117_v26 = vmul.f32 0.0, %v3004_v31  ;;  %2384 = vmatprep.subr.msk.mxu1 %vm398_vm2, %v3008_v32  ;;  %v390_v35 = vadd.f32 %v2853_v37, %v389_v34  ;;  %v3029_v37 = vld [vmem:[#allocation2 + $0x38] sm:$0xff]  ;;  %v492_v0 = vsel %vm398_vm2, %v3004_v31, 0.0 }
 0x10c   :  { %466 = vadd.xlane.f32.xlu1 %v465_v36  ;;  %445 = vadd.xlane.f32.xlu0 %v444_v38  ;;  %v3084_v56 = vld [vmem:[#allocation2 + $0xd8] sm:$0xff] }
 0x10d   :  { %1149 = vst.msk [vmem:[#allocation2 + $0xf8] sm:$0xff] %vm398_vm2, %v1117_v26  ;;  %v1116_v39 = vmul.f32 0.0, %v390_v35  ;;  %v489_v61 = vsel %vm398_vm2, %v390_v35, 0.0  ;;  %v3193_v34 = vld [vmem:[%s3565_s3 + $0x18] sm:$0xff]  ;;  %v3198_v26 = vld [vmem:[%s3565_s3 + $0x20] sm:$0xff] }
 0x10e   :  { %2385 = vmatpush3.xpose.msk.msra.mxu1 %vm398_vm2, %v3008_v32  ;;  %v3098_v60 = vld [vmem:[#allocation2 + $0xd0] sm:$0xff] }
 0x10f   :  { %1148 = vst.msk [vmem:[#allocation2 + $0xf0] sm:$0xff] %vm398_vm2, %v1116_v39  ;;  %2386 = vmatprep.subr.msk.mxu1 %vm398_vm2, %v3022_v41 }
 0x110   :  { %475 = vadd.xlane.f32.xlu1 %v474_v40  ;;  %v3051_v48 = vld [vmem:[#allocation2 + $0xe8] sm:$0xff] }
 0x111   :  { %3575 = vst [vmem:[#allocation11_spill] sm:$0xff] %v3051_v48 }
 0x112   :  { %2387 = vmatpush3.xpose.msk.msra.mxu1 %vm398_vm2, %v3022_v41  ;;  %v3065_v52 = vld [vmem:[#allocation2 + $0xe0] sm:$0xff] }
 0x113   :  { %2388 = vmatprep.subr.msk.mxu1 %vm398_vm2, %v3029_v37  ;;  %3576 = vst [vmem:[#allocation12_spill] sm:$0xff] %v3065_v52 }
 0x114   :  { %472 = vadd.xlane.f32.xlu1 %v471_v23  ;;  %v3034_v43 = vld [vmem:[#allocation2 + $0xf8] sm:$0xff] }
 0x115   :  { %3573 = vst [vmem:[#allocation9_spill] sm:$0xff] %v3034_v43  ;;  %2428 = vmatprep.subr.msk.mxu0 %vm398_vm2, %v3034_v43 }
 0x116   :  { %2389 = vmatpush3.xpose.msk.msra.mxu1 %vm398_vm2, %v3029_v37  ;;  %2429 = vmatpush3.xpose.msk.msra.mxu0 %vm398_vm2, %v3034_v43  ;;  %v3045_v47 = vld [vmem:[#allocation2 + $0xf0] sm:$0xff] }
 0x117   :  { %3574 = vst [vmem:[#allocation10_spill] sm:$0xff] %v3045_v47  ;;  %2390 = vmatprep.subr.msk.mxu1 %vm398_vm2, %v3043_v45  ;;  %2430 = vmatprep.subr.msk.mxu0 %vm398_vm2, %v3045_v47 }
 0x118   :  { %481 = vadd.xlane.f32.xlu1 %v480_v44 }
 0x11a   :  { %2391 = vmatpush3.xpose.msk.msra.mxu1 %vm398_vm2, %v3043_v45  ;;  %2431 = vmatpush3.xpose.msk.msra.mxu0 %vm398_vm2, %v3045_v47 }
 0x11b   :  { %2392 = vmatprep.subr.msk.mxu1 %vm398_vm2, %v3057_v49  ;;  %2432 = vmatprep.subr.msk.mxu0 %vm398_vm2, %v3051_v48 }
 0x11c   :  { %478 = vadd.xlane.f32.xlu1 %v477_v50 }
 0x11e   :  { %2393 = vmatpush3.xpose.msk.msra.mxu1 %vm398_vm2, %v3057_v49  ;;  %2433 = vmatpush3.xpose.msk.msra.mxu0 %vm398_vm2, %v3051_v48  ;;  %v3274_v48 = vld [vmem:[%s3565_s3 + $0x70] sm:$0xff] }
 0x11f   :  { %2394 = vmatprep.subr.msk.mxu1 %vm398_vm2, %v3072_v54  ;;  %2434 = vmatprep.subr.msk.mxu0 %vm398_vm2, %v3065_v52 }
 0x120   :  { %487 = vadd.xlane.f32.xlu1 %v486_v53 }
 0x122   :  { %2395 = vmatpush3.xpose.msk.msra.mxu1 %vm398_vm2, %v3072_v54  ;;  %2435 = vmatpush3.xpose.msk.msra.mxu0 %vm398_vm2, %v3065_v52 }
 0x123   :  { %2396 = vmatprep.subr.msk.mxu1 %vm398_vm2, %v3082_v55  ;;  %2436 = vmatprep.subr.msk.mxu0 %vm398_vm2, %v3084_v56 }
 0x124   :  { %484 = vadd.xlane.f32.xlu1 %v483_v57 }
 0x126   :  { %2397 = vmatpush3.xpose.msk.msra.mxu1 %vm398_vm2, %v3082_v55  ;;  %2437 = vmatpush3.xpose.msk.msra.mxu0 %vm398_vm2, %v3084_v56 }
 0x127   :  { %2398 = vmatprep.subr.msk.mxu1 %vm398_vm2, %v3096_v58  ;;  %2438 = vmatprep.subr.msk.mxu0 %vm398_vm2, %v3098_v60 }
 0x128   :  { %490 = vadd.xlane.f32.xlu1 %v489_v61  ;;  %v3207_v61 = vld [vmem:[%s3565_s3 + $0x28] sm:$0xff] }
 0x12a   :  { %2399 = vmatpush3.xpose.msk.msra.mxu1 %vm398_vm2, %v3096_v58  ;;  %2439 = vmatpush3.xpose.msk.msra.mxu0 %vm398_vm2, %v3098_v60 }
 0x12b   :  { %2400 = vmatprep.subr.msk.mxu1 %vm398_vm2, %v3109_v62  ;;  %2440 = vmatprep.subr.msk.mxu0 %vm398_vm2, %v3111_v63 }
 0x12c   :  { %493 = vadd.xlane.f32.xlu1 %v492_v0  ;;  %v3212_v0 = vld [vmem:[%s3565_s3 + $0x30] sm:$0xff] }
 0x12e   :  { %2401 = vmatpush3.xpose.msk.msra.mxu1 %vm398_vm2, %v3109_v62  ;;  %2441 = vmatpush3.xpose.msk.msra.mxu0 %vm398_vm2, %v3111_v63 }
 0x12f   :  { %2442 = vmatprep.subr.msk.mxu0 %vm398_vm2, %v3123_v1 }
 0x132   :  { %2443 = vmatpush3.xpose.msk.msra.mxu0 %vm398_vm2, %v3123_v1 }
 0x133   :  { %2444 = vmatprep.subr.msk.mxu0 %vm398_vm2, %v3129_v2 }
 0x136   :  { %2445 = vmatpush3.xpose.msk.msra.mxu0 %vm398_vm2, %v3129_v2 }
 0x137   :  { %2446 = vmatprep.subr.msk.mxu0 %vm398_vm2, %v3135_v3 }
 0x13a   :  { %2447 = vmatpush3.xpose.msk.msra.mxu0 %vm398_vm2, %v3135_v3 }
 0x13b   :  { %2448 = vmatprep.subr.msk.mxu0 %vm398_vm2, %v3141_v4 }
 0x13e   :  { %2449 = vmatpush3.xpose.msk.msra.mxu0 %vm398_vm2, %v3141_v4 }
 0x13f   :  { %2450 = vmatprep.subr.msk.mxu0 %vm398_vm2, %v3147_v6 }
 0x142   :  { %2451 = vmatpush3.xpose.msk.msra.mxu0 %vm398_vm2, %v3147_v6 }
 0x143   :  { %2452 = vmatprep.subr.msk.mxu0 %vm398_vm2, %v3153_v7 }
 0x146   :  { %2453 = vmatpush3.xpose.msk.msra.mxu0 %vm398_vm2, %v3153_v7 }
 0x147   :  { %2454 = vmatprep.subr.msk.mxu0 %vm398_vm2, %v3159_v8 }
 0x14a   :  { %2455 = vmatpush3.xpose.msk.msra.mxu0 %vm398_vm2, %v3159_v8 }
 0x14b   :  { %2456 = vmatprep.subr.msk.mxu0 %vm398_vm2, %v3165_v9 }
 0x14e   :  { %2457 = vmatpush3.xpose.msk.msra.mxu0 %vm398_vm2, %v3165_v9 }
 0x159   :  { %v404_v10 = vpop.xlane.xlu0 %403 }
 0x15a   :  { %v497_v18 = vmul.f32 0.03125, %v404_v10 }
 0x15c   :  { %v545_v27 = vmul.f32 %v3179_v21, %v497_v18 }
 0x15d   :  { %v401_v11 = vpop.xlane.xlu0 %400 }
 0x15e   :  { %v496_v15 = vmul.f32 0.03125, %v401_v11  ;;  %v578_v36 = vsel %vm576_vm3, %v545_v27, 0.0 }
 0x160   :  { %v544_v24 = vmul.f32 %v3174_v16, %v496_v15 }
 0x161   :  { %v410_v12 = vpop.xlane.xlu0 %409 }
 0x162   :  { %v577_v29 = vsel %vm576_vm3, %v544_v24, 0.0  ;;  %v499_v30 = vmul.f32 0.03125, %v410_v12 }
 0x163   :  { %v579_v39 = vadd.f32 %v578_v36, %v577_v29 }
 0x164   :  { %v547_v40 = vmul.f32 %v3193_v34, %v499_v30 }
 0x165   :  { %v407_v14 = vpop.xlane.xlu0 %406 }
 0x166   :  { %v498_v20 = vmul.f32 0.03125, %v407_v14  ;;  %v582_v10 = vsel %vm576_vm3, %v547_v40, 0.0 }
 0x168   :  { %v546_v28 = vmul.f32 %v3184_v22, %v498_v20 }
 0x169   :  { %v416_v17 = vpop.xlane.xlu0 %415 }
 0x16a   :  { %v580_v38 = vsel %vm576_vm3, %v546_v28, 0.0  ;;  %v501_v53 = vmul.f32 0.03125, %v416_v17  ;;  %v3226_v28 = vld [vmem:[%s3565_s3 + $0x40] sm:$0xff] }
 0x16b   :  { %v581_v44 = vadd.f32 %v580_v38, %v579_v39 }
 0x16c   :  { %v549_v17 = vmul.f32 %v3207_v61, %v501_v53  ;;  %v3235_v53 = vld [vmem:[%s3565_s3 + $0x48] sm:$0xff] }
 0x16d   :  { %v413_v19 = vpop.xlane.xlu0 %412  ;;  %v583_v12 = vadd.f32 %v582_v10, %v581_v44 }
 0x16e   :  { %v500_v31 = vmul.f32 0.03125, %v413_v19  ;;  %v3221_v19 = vld [vmem:[%s3565_s3 + $0x38] sm:$0xff]  ;;  %v586_v30 = vsel %vm576_vm3, %v549_v17, 0.0  ;;  %v3242_v17 = vld [vmem:[%s3565_s3 + $0x50] sm:$0xff] }
 0x170   :  { %v548_v23 = vmul.f32 %v3198_v26, %v500_v31 }
 0x171   :  { %v422_v35 = vpop.xlane.xlu0 %421 }
 0x172   :  { %v584_v11 = vsel %vm576_vm3, %v548_v23, 0.0  ;;  %v503_v24 = vmul.f32 0.03125, %v422_v35 }
 0x173   :  { %v585_v20 = vadd.f32 %v584_v11, %v583_v12 }
 0x174   :  { %v551_v35 = vmul.f32 %v3221_v19, %v503_v24 }
 0x175   :  { %v419_v50 = vpop.xlane.xlu0 %418  ;;  %v587_v38 = vadd.f32 %v586_v30, %v585_v20 }
 0x176   :  { %v502_v57 = vmul.f32 0.03125, %v419_v50 }
 0x178   :  { %v550_v18 = vmul.f32 %v3212_v0, %v502_v57  ;;  %v590_v57 = vsel %vm576_vm3, %v551_v35, 0.0 }
 0x179   :  { %v452_v14 = vpop.xlane.xlu1 %451  ;;  %v428_v15 = vpop.xlane.xlu0 %427 }
 0x17a   :  { %v588_v31 = vsel %vm576_vm3, %v550_v18, 0.0  ;;  %v505_v50 = vmul.f32 0.03125, %v428_v15 }
 0x17b   :  { %v589_v40 = vadd.f32 %v588_v31, %v587_v38 }
 0x17c   :  { %v553_v20 = vmul.f32 %v3235_v53, %v505_v50 }
 0x17d   :  { %v449_v27 = vpop.xlane.xlu1 %448  ;;  %v425_v29 = vpop.xlane.xlu0 %424  ;;  %v591_v11 = vadd.f32 %v590_v57, %v589_v40 }
 0x17e   :  { %v504_v36 = vmul.f32 0.03125, %v425_v29  ;;  %v512_v24 = vmul.f32 0.03125, %v449_v27  ;;  %v594_v40 = vsel %vm576_vm3, %v553_v20, 0.0 }
 0x180   :  { %v552_v39 = vmul.f32 %v3226_v28, %v504_v36  ;;  %v3249_v36 = vld [vmem:[%s3565_s3 + $0x58] sm:$0xff]  ;;  %v560_v50 = vmul.f32 %v3174_v16, %v512_v24 }
 0x181   :  { %v458_v23 = vpop.xlane.xlu1 %457  ;;  %v434_v44 = vpop.xlane.xlu0 %433 }
 0x182   :  { %v592_v10 = vsel %vm576_vm3, %v552_v39, 0.0  ;;  %v507_v30 = vmul.f32 0.03125, %v434_v44  ;;  %v513_v39 = vmul.f32 0.03125, %v452_v14  ;;  %v3263_v14 = vld [vmem:[%s3565_s3 + $0x60] sm:$0xff] }
 0x183   :  { %v593_v29 = vadd.f32 %v592_v10, %v591_v11 }
 0x184   :  { %v555_v44 = vmul.f32 %v3249_v36, %v507_v30  ;;  %v561_v20 = vmul.f32 %v3179_v21, %v513_v39 }
 0x185   :  { %v455_v12 = vpop.xlane.xlu1 %454  ;;  %v431_v18 = vpop.xlane.xlu0 %430  ;;  %v595_v27 = vadd.f32 %v594_v40, %v593_v29  ;;  %v614_v29 = vsel %vm576_vm3, %v560_v50, 0.0 }
 0x186   :  { %v506_v15 = vmul.f32 0.03125, %v431_v18  ;;  %v514_v57 = vmul.f32 0.03125, %v455_v12  ;;  %v3258_v18 = vld [vmem:[%s3565_s3 + $0x68] sm:$0xff]  ;;  %v598_v30 = vsel %vm576_vm3, %v555_v44, 0.0 }
 0x188   :  { %v554_v31 = vmul.f32 %v3242_v17, %v506_v15  ;;  %v562_v16 = vmul.f32 %v3184_v22, %v514_v57  ;;  %v615_v22 = vsel %vm576_vm3, %v561_v20, 0.0  ;;  %v3286_v20 = vld [vmem:[%s3565_s3 + $0x78] sm:$0xff] }
 0x189   :  { %v464_v38 = vpop.xlane.xlu1 %463  ;;  %v440_v35 = vpop.xlane.xlu0 %439  ;;  %v616_v50 = vadd.f32 %v615_v22, %v614_v29 }
 0x18a   :  { %v596_v43 = vsel %vm576_vm3, %v554_v31, 0.0  ;;  %v509_v10 = vmul.f32 0.03125, %v440_v35  ;;  %v617_v39 = vsel %vm576_vm3, %v562_v16, 0.0 }
 0x18b   :  { %v597_v11 = vadd.f32 %v596_v43, %v595_v27  ;;  %v515_v43 = vmul.f32 0.03125, %v458_v23 }
 0x18c   :  { %v557_v31 = vmul.f32 %v3258_v18, %v509_v10 }
 0x18d   :  { %v461_v15 = vpop.xlane.xlu1 %460  ;;  %v437_v12 = vpop.xlane.xlu0 %436  ;;  %v599_v27 = vadd.f32 %v598_v30, %v597_v11  ;;  %v563_v10 = vmul.f32 %v3193_v34, %v515_v43 }
 0x18e   :  { %v508_v24 = vmul.f32 0.03125, %v437_v12  ;;  %v516_v35 = vmul.f32 0.03125, %v461_v15  ;;  %v602_v11 = vsel %vm576_vm3, %v557_v31, 0.0 }
 0x18f   :  { %v619_v43 = vsel %vm576_vm3, %v563_v10, 0.0 }
 0x190   :  { %v556_v40 = vmul.f32 %v3263_v14, %v508_v24  ;;  %v564_v15 = vmul.f32 %v3198_v26, %v516_v35  ;;  %v618_v24 = vadd.f32 %v617_v39, %v616_v50 }
 0x191   :  { %v470_v47 = vpop.xlane.xlu1 %469  ;;  %v443_v21 = vpop.xlane.xlu0 %442 }
 0x192   :  { %v600_v23 = vsel %vm576_vm3, %v556_v40, 0.0  ;;  %v510_v57 = vmul.f32 0.03125, %v443_v21  ;;  %v517_v40 = vmul.f32 0.03125, %v464_v38  ;;  %v621_v26 = vsel %vm576_vm3, %v564_v15, 0.0 }
 0x193   :  { %v601_v44 = vadd.f32 %v600_v23, %v599_v27  ;;  %v620_v35 = vadd.f32 %v619_v43, %v618_v24 }
 0x194   :  { %v558_v12 = vmul.f32 %v3274_v48, %v510_v57  ;;  %v565_v39 = vmul.f32 %v3207_v61, %v517_v40 }
 0x195   :  { %v603_v30 = vadd.f32 %v602_v11, %v601_v44  ;;  %v467_v52 = vpop.xlane.xlu1 %466  ;;  %v446_v16 = vpop.xlane.xlu0 %445  ;;  %v622_v38 = vadd.f32 %v621_v26, %v620_v35  ;;  %v519_v44 = vmul.f32 0.03125, %v470_v47 }
 0x196   :  { %v604_v29 = vsel %vm576_vm3, %v558_v12, 0.0  ;;  %v518_v27 = vmul.f32 0.03125, %v467_v52  ;;  %v511_v34 = vmul.f32 0.03125, %v446_v16  ;;  %v623_v10 = vsel %vm576_vm3, %v565_v39, 0.0 }
 0x197   :  { %v605_v21 = vadd.f32 %v604_v29, %v603_v30  ;;  %v624_v16 = vadd.f32 %v623_v10, %v622_v38  ;;  %v567_v30 = vmul.f32 %v3221_v19, %v519_v44 }
 0x198   :  { %v559_v31 = vmul.f32 %v3286_v20, %v511_v34  ;;  %v566_v23 = vmul.f32 %v3212_v0, %v518_v27 }
 0x199   :  { %v476_v22 = vpop.xlane.xlu1 %475  ;;  %v627_v47 = vsel %vm576_vm3, %v567_v30, 0.0 }
 0x19a   :  { %v606_v57 = vsel %vm576_vm3, %v559_v31, 0.0  ;;  %v625_v15 = vsel %vm576_vm3, %v566_v23, 0.0  ;;  %v521_v27 = vmul.f32 0.03125, %v476_v22  ;;  %v653_v22 = vld [vmem:[%s3566_s4] sm:$0xff]  ;;  %s2668_s4 = smov [#allocation5]  }
 0x19b   :  { %v607_v50 = vadd.f32 %v606_v57, %v605_v21  ;;  %v626_v40 = vadd.f32 %v625_v15, %v624_v16  ;;  %s2068_s26 = sshll.u32 %s2668_s4, 4  ;;  %s2069_s26 = int_to_ptr.vmem [resolvable:$true] %s2068_s26 }
 0x19c   :  { %v569_v21 = vmul.f32 %v3235_v53, %v521_v27  ;;  %s2624_s27 = scalar_lea.vmem %s2069_s26, 4096  ;;  %p2629_p1 = scmp.lt.s32.totalorder %s2069_s26, %s2069_s26 }
 0x19d   :  { %v608_v52 = vrot.slane %v607_v50, 4  ;;  %v473_v11 = vpop.xlane.xlu1 %472  ;;  %v628_v26 = vadd.f32 %v627_v47, %v626_v40  ;;  %p2625_p0 = scmp.ne.s32.totalorder %s2069_s26, %s2624_s27  ;;  %p2630_p2 = scmp.lt.s32.totalorder %s2624_s27, %s2624_s27 }
 0x19e   :  { %v520_v12 = vmul.f32 0.03125, %v473_v11  ;;  %v631_v44 = vsel %vm576_vm3, %v569_v21, 0.0 }
 0x19f   :  { %v609_v24 = vadd.f32 %v608_v52, %v607_v50  ;;  %p2631_p3 = por %p2630_p2, %p2629_p1 }
 0x1a0   :  { %v568_v61 = vmul.f32 %v3226_v28, %v520_v12 }
 0x1a1   :  { %v482_v0 = vpop.xlane.xlu1 %481  ;;  %v610_v29 = vrot.slane %v609_v24, 2  ;;  %p2632_p4 = pnand %p2631_p3, %p2625_p0 }
 0x1a2   :  { %v629_v43 = vsel %vm576_vm3, %v568_v61, 0.0  ;;  %v523_v19 = vmul.f32 0.03125, %v482_v0 }
 0x1a3   :  { %v611_v34 = vadd.f32 %v610_v29, %v609_v24  ;;  %v630_v23 = vadd.f32 %v629_v43, %v628_v26 }
 0x1a4   :  { %v571_v53 = vmul.f32 %v3249_v36, %v523_v19 }
 0x1a5   :  { %v479_v31 = vpop.xlane.xlu1 %478  ;;  %v612_v35 = vrot.slane %v611_v34, 1  ;;  %v632_v11 = vadd.f32 %v631_v44, %v630_v23 }
 0x1a6   :  { %v522_v39 = vmul.f32 0.03125, %v479_v31  ;;  %v635_v30 = vsel %vm576_vm3, %v571_v53, 0.0 }
 0x1a7   :  { %v613_v57 = vadd.f32 %v612_v35, %v611_v34 }
 0x1a8   :  { %v570_v28 = vmul.f32 %v3242_v17, %v522_v39 }
 0x1a9   :  { %v488_v38 = vpop.xlane.xlu1 %487  ;;  %v651_v50 = vmax.f32 %v613_v57, 0.0 }
 0x1aa   :  { %v633_v52 = vsel %vm576_vm3, %v570_v28, 0.0  ;;  %v525_v15 = vmul.f32 0.03125, %v488_v38 }
 0x1ab   :  { %v669_v10 = vmul.f32 %v653_v22, %v651_v50  ;;  %v634_v12 = vadd.f32 %v633_v52, %v632_v11 }
 0x1ac   :  { %v573_v61 = vmul.f32 %v3258_v18, %v525_v15 }
 0x1ad   :  { %v485_v16 = vpop.xlane.xlu1 %484  ;;  %v701_v24 = vsel %vm576_vm3, %v669_v10, 0.0  ;;  %v636_v0 = vadd.f32 %v635_v30, %v634_v12 }
 0x1ae   :  { %v524_v17 = vmul.f32 0.03125, %v485_v16  ;;  %702 = vadd.xlane.f32.xlu0 %v701_v24  ;;  %v639_v36 = vsel %vm576_vm3, %v573_v61, 0.0 }
 0x1b0   :  { %v572_v40 = vmul.f32 %v3263_v14, %v524_v17 }
 0x1b1   :  { %v491_v29 = vpop.xlane.xlu1 %490 }
 0x1b2   :  { %v637_v27 = vsel %vm576_vm3, %v572_v40, 0.0  ;;  %v526_v34 = vmul.f32 0.03125, %v491_v29 }
 0x1b3   :  { %v638_v47 = vadd.f32 %v637_v27, %v636_v0 }
 0x1b4   :  { %v574_v43 = vmul.f32 %v3274_v48, %v526_v34 }
 0x1b5   :  { %v640_v26 = vadd.f32 %v639_v36, %v638_v47  ;;  %v494_v31 = vpop.xlane.xlu1 %493 }
 0x1b6   :  { %v641_v35 = vsel %vm576_vm3, %v574_v43, 0.0  ;;  %v527_v21 = vmul.f32 0.03125, %v494_v31 }
 0x1b7   :  { %v642_v18 = vadd.f32 %v641_v35, %v640_v26 }
 0x1b8   :  { %v575_v39 = vmul.f32 %v3286_v20, %v527_v21 }
 0x1ba   :  { %v643_v14 = vsel %vm576_vm3, %v575_v39, 0.0 }
 0x1bb   :  { %v644_v23 = vadd.f32 %v643_v14, %v642_v18 }
 0x1bd   :  { %v645_v57 = vrot.slane %v644_v23, 4 }
 0x1bf   :  { %v646_v19 = vadd.f32 %v645_v57, %v644_v23 }
 0x1c1   :  { %v647_v28 = vrot.slane %v646_v19, 2 }
 0x1c3   :  { %v648_v38 = vadd.f32 %v647_v28, %v646_v19 }
 0x1c5   :  { %v649_v50 = vrot.slane %v648_v38, 1 }
 0x1c7   :  { %v650_v44 = vadd.f32 %v649_v50, %v648_v38 }
 0x1c9   :  { %v652_v52 = vmax.f32 %v650_v44, 0.0 }
 0x1cb   :  { %v685_v11 = vmul.f32 %v653_v22, %v652_v52 }
 0x1cd   :  { %v749_v48 = vsel %vm576_vm3, %v685_v11, 0.0 }
 0x1ce   :  { %750 = vadd.xlane.f32.xlu1 %v749_v48 }
 0x237   :  { %v703_v10 = vpop.xlane.xlu0 %702 }
 0x238   :  { %v2117_v53 = vmul.f32 -1.442695, %v703_v10 }
 0x23a   :  { %2488 = vpow2.f32 %v2117_v53 }
 0x247   :  { %v2489_v15 = vpop.eup %2488 }
 0x248   :  { %v893_v20 = vadd.f32 1.0, %v2489_v15 }
 0x24a   :  { %2490 = vrcp.f32 %v893_v20 }
 0x257   :  { %v2491_v12 = vpop.eup %2490  ;;  %v751_v16 = vpop.xlane.xlu1 %750 }
 0x258   :  { %v1086_v24 = vmul.f32 %v2491_v12, %v2857_v42  ;;  %v2133_v17 = vmul.f32 -1.442695, %v751_v16 }
 0x25a   :  { %1118 = vst.msk [vmem:[#allocation2] sm:$0xff] %vm398_vm2, %v1086_v24  ;;  %2492 = vpow2.f32 %v2133_v17 }
 0x261   :  { %v1184_v30 = vld [vmem:[#allocation2] sm:$0xff] }
 0x262   :  { %2402 = vmatprep.subr.msk.mxu1 %vm398_vm2, %v1184_v30  ;;  %2404 = vmatprep.mubr.msk.f32.mxu1 %vm398_vm2, %v1184_v30 }
 0x263   :  { %2403 = vmatpush3.xpose.msk.msra.mxu1 %vm398_vm2, %v1184_v30 }
 0x266   :  { %2405 = vmatmul.mubr.msk.f32.vlgmr.msra.gmra.mxu1 %vm398_vm2, %v3109_v62 }
 0x267   :  { %v2493_v22 = vpop.eup %2492  ;;  %2407 = vmatprep.mubr.msk.f32.mxu1 %vm398_vm2, %v3096_v58 }
 0x268   :  { %v909_v61 = vadd.f32 1.0, %v2493_v22 }
 0x26a   :  { %2494 = vrcp.f32 %v909_v61  ;;  %2408 = vmatmul.mubr.msk.f32.gmra.mxu1 %vm398_vm2, %v3082_v55 }
 0x26b   :  { %2410 = vmatprep.mubr.msk.f32.mxu1 %vm398_vm2, %v3072_v54 }
 0x26e   :  { %2411 = vmatmul.mubr.msk.f32.gmra.mxu1 %vm398_vm2, %v3057_v49 }
 0x26f   :  { %2413 = vmatprep.mubr.msk.f32.mxu1 %vm398_vm2, %v3043_v45 }
 0x272   :  { %2414 = vmatmul.mubr.msk.f32.gmra.mxu1 %vm398_vm2, %v3029_v37 }
 0x273   :  { %2416 = vmatprep.mubr.msk.f32.mxu1 %vm398_vm2, %v3022_v41 }
 0x276   :  { %2417 = vmatmul.mubr.msk.f32.gmra.mxu1 %vm398_vm2, %v3008_v32 }
 0x277   :  { %v2495_v42 = vpop.eup %2494  ;;  %2419 = vmatprep.mubr.msk.f32.mxu1 %vm398_vm2, %v2991_v25 }
 0x278   :  { %v1102_v54 = vmul.f32 %v2495_v42, %v2917_v33  ;;  %v3577_v33 = vld [vmem:[#allocation12_spill] sm:$0xff] }
 0x27a   :  { %1134 = vst.msk [vmem:[#allocation2 + $0x80] sm:$0xff] %vm398_vm2, %v1102_v54  ;;  %2420 = vmatmul.mubr.msk.f32.gmra.mxu1 %vm398_vm2, %v2974_v13 }
 0x27b   :  { %2422 = vmatprep.mubr.msk.f32.mxu1 %vm398_vm2, %v2962_v5 }
 0x27e   :  { %2423 = vmatmul.mubr.msk.f32.gmra.mxu1 %vm398_vm2, %v2948_v59  ;;  %v3580_v59 = vld [vmem:[#allocation9_spill] sm:$0xff] }
 0x27f   :  { %2425 = vmatprep.mubr.msk.f32.mxu1 %vm398_vm2, %v2936_v51  ;;  %v3579_v51 = vld [vmem:[#allocation10_spill] sm:$0xff] }
 0x281   :  { %v1200_v32 = vld [vmem:[#allocation2 + $0x80] sm:$0xff] }
 0x282   :  { %2426 = vmatmul.mubr.msk.f32.gmra.mxu1 %vm398_vm2, %v2927_v46  ;;  %2458 = vmatprep.subr.msk.mxu0 %vm398_vm2, %v1200_v32  ;;  %v3578_v46 = vld [vmem:[#allocation11_spill] sm:$0xff] }
 0x283   :  { %2460 = vmatprep.mubr.msk.f32.mxu0 %vm398_vm2, %v1200_v32  ;;  %2459 = vmatpush3.xpose.msk.msra.mxu0 %vm398_vm2, %v1200_v32 }
 0x286   :  { %2461 = vmatmul.mubr.msk.f32.vlgmr.msra.gmra.mxu0 %vm398_vm2, %v3165_v9 }
 0x287   :  { %2463 = vmatprep.mubr.msk.f32.mxu0 %vm398_vm2, %v3159_v8 }
 0x28a   :  { %2464 = vmatmul.mubr.msk.f32.gmra.mxu0 %vm398_vm2, %v3153_v7 }
 0x28b   :  { %2466 = vmatprep.mubr.msk.f32.mxu0 %vm398_vm2, %v3147_v6 }
 0x28e   :  { %2467 = vmatmul.mubr.msk.f32.gmra.mxu0 %vm398_vm2, %v3141_v4 }
 0x28f   :  { %2469 = vmatprep.mubr.msk.f32.mxu0 %vm398_vm2, %v3135_v3 }
 0x292   :  { %2470 = vmatmul.mubr.msk.f32.gmra.mxu0 %vm398_vm2, %v3129_v2 }
 0x293   :  { %2472 = vmatprep.mubr.msk.f32.mxu0 %vm398_vm2, %v3123_v1 }
 0x296   :  { %2473 = vmatmul.mubr.msk.f32.gmra.mxu0 %vm398_vm2, %v3111_v63 }
 0x297   :  { %2475 = vmatprep.mubr.msk.f32.mxu0 %vm398_vm2, %v3098_v60 }
 0x29a   :  { %2476 = vmatmul.mubr.msk.f32.gmra.mxu0 %vm398_vm2, %v3084_v56 }
 0x29b   :  { %2478 = vmatprep.mubr.msk.f32.mxu0 %vm398_vm2, %v3577_v33 }
 0x29e   :  { %2479 = vmatmul.mubr.msk.f32.gmra.mxu0 %vm398_vm2, %v3578_v46 }
 0x29f   :  { %2481 = vmatprep.mubr.msk.f32.mxu0 %vm398_vm2, %v3579_v51 }
 0x2a2   :  { %2482 = vmatmul.mubr.msk.f32.gmra.mxu0 %vm398_vm2, %v3580_v59 }
 0x326   :  { %v2406_v5 = vpop.f32.mrf.mxu1 }
 0x327   :  { %v1700_v13 = vmul.f32 1.5, %v2406_v5 }
 0x328   :  { %v1379_v25 = vpop.f32.mrf.mxu1 }
 0x329   :  { %2496 = vtanh.f32 %v1700_v13  ;;  %v1699_v41 = vmul.f32 1.5, %v1379_v25 }
 0x32a   :  { %v2409_v37 = vpop.f32.mrf.mxu1 }
 0x32b   :  { %2498 = vtanh.f32 %v1699_v41  ;;  %v1702_v45 = vmul.f32 1.5, %v2409_v37 }
 0x32c   :  { %v1389_v49 = vpop.f32.mrf.mxu1 }
 0x32d   :  { %2500 = vtanh.f32 %v1702_v45  ;;  %v1701_v55 = vmul.f32 1.5, %v1389_v49 }
 0x32e   :  { %v2412_v56 = vpop.f32.mrf.mxu1 }
 0x32f   :  { %2502 = vtanh.f32 %v1701_v55  ;;  %v1704_v58 = vmul.f32 1.5, %v2412_v56 }
 0x330   :  { %v1399_v60 = vpop.f32.mrf.mxu1 }
 0x331   :  { %2504 = vtanh.f32 %v1704_v58  ;;  %v1703_v62 = vmul.f32 1.5, %v1399_v60 }
 0x332   :  { %v2415_v63 = vpop.f32.mrf.mxu1 }
 0x333   :  { %2506 = vtanh.f32 %v1703_v62  ;;  %v1706_v1 = vmul.f32 1.5, %v2415_v63 }
 0x334   :  { %v1409_v2 = vpop.f32.mrf.mxu1 }
 0x335   :  { %2508 = vtanh.f32 %v1706_v1  ;;  %v1705_v3 = vmul.f32 1.5, %v1409_v2 }
 0x336   :  { %v2497_v4 = vpop.eup %2496  ;;  %v2418_v6 = vpop.f32.mrf.mxu1 }
 0x337   :  { %2510 = vtanh.f32 %v1705_v3  ;;  %v1708_v7 = vmul.f32 1.5, %v2418_v6  ;;  %v3390_v8 = vmax.f32 %v2497_v4, 0.0 }
 0x338   :  { %v2499_v9 = vpop.eup %2498  ;;  %v1419_v40 = vpop.f32.mrf.mxu1 }
 0x339   :  { %2512 = vtanh.f32 %v1708_v7  ;;  %v1707_v0 = vmul.f32 1.5, %v1419_v40  ;;  %1797 = vadd.xlane.f32.xlu1 %v3390_v8  ;;  %1956 = vst [vmem:[#allocation5 + $0x8] sm:$0xff] %v3390_v8  ;;  %v3394_v29 = vmax.f32 %v2499_v9, 0.0 }
 0x33a   :  { %v2501_v27 = vpop.eup %2500  ;;  %v2421_v34 = vpop.f32.mrf.mxu1 }
 0x33b   :  { %2514 = vtanh.f32 %v1707_v0  ;;  %v1710_v47 = vmul.f32 1.5, %v2421_v34  ;;  %1795 = vadd.xlane.f32.xlu0 %v3394_v29  ;;  %1955 = vst [vmem:[#allocation5] sm:$0xff] %v3394_v29  ;;  %v3398_v36 = vmax.f32 %v2501_v27, 0.0 }
 0x33c   :  { %v2503_v43 = vpop.eup %2502  ;;  %v1429_v26 = vpop.f32.mrf.mxu1 }
 0x33d   :  { %2516 = vtanh.f32 %v1710_v47  ;;  %v1709_v31 = vmul.f32 1.5, %v1429_v26  ;;  %1801 = vadd.xlane.f32.xlu1 %v3398_v36  ;;  %1958 = vst [vmem:[#allocation5 + $0x18] sm:$0xff] %v3398_v36  ;;  %v3402_v35 = vmax.f32 %v2503_v43, 0.0 }
 0x33e   :  { %v2505_v21 = vpop.eup %2504  ;;  %v2424_v39 = vpop.f32.mrf.mxu1 }
 0x33f   :  { %2518 = vtanh.f32 %v1709_v31  ;;  %v1712_v18 = vmul.f32 1.5, %v2424_v39  ;;  %1799 = vadd.xlane.f32.xlu0 %v3402_v35  ;;  %1957 = vst [vmem:[#allocation5 + $0x10] sm:$0xff] %v3402_v35  ;;  %v3406_v14 = vmax.f32 %v2505_v21, 0.0 }
 0x340   :  { %v2507_v23 = vpop.eup %2506  ;;  %v1439_v57 = vpop.f32.mrf.mxu1 }
 0x341   :  { %2520 = vtanh.f32 %v1712_v18  ;;  %v1711_v19 = vmul.f32 1.5, %v1439_v57  ;;  %1805 = vadd.xlane.f32.xlu1 %v3406_v14  ;;  %1960 = vst [vmem:[#allocation5 + $0x28] sm:$0xff] %v3406_v14  ;;  %v3410_v28 = vmax.f32 %v2507_v23, 0.0 }
 0x342   :  { %v2509_v38 = vpop.eup %2508  ;;  %v2427_v50 = vpop.f32.mrf.mxu1 }
 0x343   :  { %2522 = vtanh.f32 %v1711_v19  ;;  %v1714_v44 = vmul.f32 1.5, %v2427_v50  ;;  %1803 = vadd.xlane.f32.xlu0 %v3410_v28  ;;  %1959 = vst [vmem:[#allocation5 + $0x20] sm:$0xff] %v3410_v28  ;;  %v3414_v52 = vmax.f32 %v2509_v38, 0.0 }
 0x344   :  { %v2511_v11 = vpop.eup %2510  ;;  %v1449_v48 = vpop.f32.mrf.mxu1 }
 0x345   :  { %2524 = vtanh.f32 %v1714_v44  ;;  %v1713_v10 = vmul.f32 1.5, %v1449_v48  ;;  %1809 = vadd.xlane.f32.xlu1 %v3414_v52  ;;  %1962 = vst [vmem:[#allocation5 + $0x38] sm:$0xff] %v3414_v52  ;;  %v3418_v53 = vmax.f32 %v2511_v11, 0.0 }
 0x346   :  { %v2513_v15 = vpop.eup %2512  ;;  %v2462_v20 = vpop.f32.mrf.mxu0 }
 0x347   :  { %2526 = vtanh.f32 %v1713_v10  ;;  %v1716_v12 = vmul.f32 1.5, %v2462_v20  ;;  %1807 = vadd.xlane.f32.xlu0 %v3418_v53  ;;  %1961 = vst [vmem:[#allocation5 + $0x30] sm:$0xff] %v3418_v53  ;;  %v3422_v16 = vmax.f32 %v2513_v15, 0.0 }
 0x348   :  { %v2515_v24 = vpop.eup %2514  ;;  %v1620_v17 = vpop.f32.mrf.mxu0 }
 0x349   :  { %2528 = vtanh.f32 %v1716_v12  ;;  %v1715_v30 = vmul.f32 1.5, %v1620_v17  ;;  %1813 = vadd.xlane.f32.xlu1 %v3422_v16  ;;  %1964 = vst [vmem:[#allocation5 + $0x48] sm:$0xff] %v3422_v16  ;;  %v3426_v22 = vmax.f32 %v2515_v24, 0.0 }
 0x34a   :  { %v2517_v61 = vpop.eup %2516  ;;  %v2465_v42 = vpop.f32.mrf.mxu0 }
 0x34b   :  { %2530 = vtanh.f32 %v1715_v30  ;;  %v1718_v54 = vmul.f32 1.5, %v2465_v42  ;;  %1811 = vadd.xlane.f32.xlu0 %v3426_v22  ;;  %1963 = vst [vmem:[#allocation5 + $0x40] sm:$0xff] %v3426_v22  ;;  %v3430_v32 = vmax.f32 %v2517_v61, 0.0 }
 0x34c   :  { %v2519_v33 = vpop.eup %2518  ;;  %v1630_v46 = vpop.f32.mrf.mxu0 }
 0x34d   :  { %2532 = vtanh.f32 %v1718_v54  ;;  %v1717_v51 = vmul.f32 1.5, %v1630_v46  ;;  %1817 = vadd.xlane.f32.xlu1 %v3430_v32  ;;  %1966 = vst [vmem:[#allocation5 + $0x58] sm:$0xff] %v3430_v32  ;;  %v3434_v59 = vmax.f32 %v2519_v33, 0.0 }
 0x34e   :  { %v2521_v5 = vpop.eup %2520  ;;  %v2468_v13 = vpop.f32.mrf.mxu0 }
 0x34f   :  { %2534 = vtanh.f32 %v1717_v51  ;;  %v1720_v25 = vmul.f32 1.5, %v2468_v13  ;;  %1815 = vadd.xlane.f32.xlu0 %v3434_v59  ;;  %1965 = vst [vmem:[#allocation5 + $0x50] sm:$0xff] %v3434_v59  ;;  %v3438_v41 = vmax.f32 %v2521_v5, 0.0 }
 0x350   :  { %v2523_v37 = vpop.eup %2522  ;;  %v1640_v45 = vpop.f32.mrf.mxu0 }
 0x351   :  { %2536 = vtanh.f32 %v1720_v25  ;;  %v1719_v49 = vmul.f32 1.5, %v1640_v45  ;;  %1821 = vadd.xlane.f32.xlu1 %v3438_v41  ;;  %1968 = vst [vmem:[#allocation5 + $0x68] sm:$0xff] %v3438_v41  ;;  %v3442_v55 = vmax.f32 %v2523_v37, 0.0 }
 0x352   :  { %v2525_v56 = vpop.eup %2524  ;;  %v2471_v58 = vpop.f32.mrf.mxu0 }
 0x353   :  { %2538 = vtanh.f32 %v1719_v49  ;;  %v1722_v60 = vmul.f32 1.5, %v2471_v58  ;;  %1819 = vadd.xlane.f32.xlu0 %v3442_v55  ;;  %1967 = vst [vmem:[#allocation5 + $0x60] sm:$0xff] %v3442_v55  ;;  %v3446_v62 = vmax.f32 %v2525_v56, 0.0 }
 0x354   :  { %v2527_v63 = vpop.eup %2526  ;;  %v1650_v1 = vpop.f32.mrf.mxu0 }
 0x355   :  { %v3448_v2 = vmax.f32 %v2527_v63, 0.0  ;;  %2540 = vtanh.f32 %v1722_v60  ;;  %v1721_v3 = vmul.f32 1.5, %v1650_v1  ;;  %1825 = vadd.xlane.f32.xlu1 %v3446_v62  ;;  %1970 = vst [vmem:[#allocation5 + $0x78] sm:$0xff] %v3446_v62 }
 0x356   :  { %v2529_v4 = vpop.eup %2528  ;;  %v2474_v6 = vpop.f32.mrf.mxu0 }
 0x357   :  { %1969 = vst [vmem:[#allocation5 + $0x70] sm:$0xff] %v3448_v2  ;;  %2542 = vtanh.f32 %v1721_v3  ;;  %v1724_v7 = vmul.f32 1.5, %v2474_v6  ;;  %1823 = vadd.xlane.f32.xlu0 %v3448_v2  ;;  %v3454_v9 = vmax.f32 %v2529_v4, 0.0 }
 0x358   :  { %v2531_v40 = vpop.eup %2530  ;;  %v1660_v0 = vpop.f32.mrf.mxu0 }
 0x359   :  { %2544 = vtanh.f32 %v1724_v7  ;;  %v1723_v27 = vmul.f32 1.5, %v1660_v0  ;;  %1972 = vst [vmem:[#allocation5 + $0x88] sm:$0xff] %v3454_v9  ;;  %1829 = vadd.xlane.f32.xlu1 %v3454_v9  ;;  %v3458_v34 = vmax.f32 %v2531_v40, 0.0 }
 0x35a   :  { %v2533_v47 = vpop.eup %2532  ;;  %v2477_v43 = vpop.f32.mrf.mxu0 }
 0x35b   :  { %2546 = vtanh.f32 %v1723_v27  ;;  %v1726_v26 = vmul.f32 1.5, %v2477_v43  ;;  %1971 = vst [vmem:[#allocation5 + $0x80] sm:$0xff] %v3458_v34  ;;  %1827 = vadd.xlane.f32.xlu0 %v3458_v34  ;;  %v3462_v31 = vmax.f32 %v2533_v47, 0.0 }
 0x35c   :  { %v2535_v21 = vpop.eup %2534  ;;  %v1670_v39 = vpop.f32.mrf.mxu0 }
 0x35d   :  { %2548 = vtanh.f32 %v1726_v26  ;;  %v1725_v18 = vmul.f32 1.5, %v1670_v39  ;;  %1974 = vst [vmem:[#allocation5 + $0x98] sm:$0xff] %v3462_v31  ;;  %1833 = vadd.xlane.f32.xlu1 %v3462_v31  ;;  %v3466_v23 = vmax.f32 %v2535_v21, 0.0 }
 0x35e   :  { %v2537_v57 = vpop.eup %2536  ;;  %v2480_v19 = vpop.f32.mrf.mxu0 }
 0x35f   :  { %2550 = vtanh.f32 %v1725_v18  ;;  %v1728_v38 = vmul.f32 1.5, %v2480_v19  ;;  %1973 = vst [vmem:[#allocation5 + $0x90] sm:$0xff] %v3466_v23  ;;  %1831 = vadd.xlane.f32.xlu0 %v3466_v23  ;;  %v3470_v50 = vmax.f32 %v2537_v57, 0.0 }
 0x360   :  { %v2539_v44 = vpop.eup %2538  ;;  %v1680_v11 = vpop.f32.mrf.mxu0 }
 0x361   :  { %2552 = vtanh.f32 %v1728_v38  ;;  %v1727_v48 = vmul.f32 1.5, %v1680_v11  ;;  %1976 = vst [vmem:[#allocation5 + $0xa8] sm:$0xff] %v3470_v50  ;;  %1837 = vadd.xlane.f32.xlu1 %v3470_v50  ;;  %v3474_v10 = vmax.f32 %v2539_v44, 0.0 }
 0x362   :  { %v2541_v15 = vpop.eup %2540  ;;  %v2483_v20 = vpop.f32.mrf.mxu0 }
 0x363   :  { %2554 = vtanh.f32 %v1727_v48  ;;  %v1730_v12 = vmul.f32 1.5, %v2483_v20  ;;  %1975 = vst [vmem:[#allocation5 + $0xa0] sm:$0xff] %v3474_v10  ;;  %1835 = vadd.xlane.f32.xlu0 %v3474_v10  ;;  %v3478_v24 = vmax.f32 %v2541_v15, 0.0 }
 0x364   :  { %v2543_v17 = vpop.eup %2542  ;;  %v1690_v30 = vpop.f32.mrf.mxu0 }
 0x365   :  { %2556 = vtanh.f32 %v1730_v12  ;;  %v1729_v61 = vmul.f32 1.5, %v1690_v30  ;;  %1978 = vst [vmem:[#allocation5 + $0xb8] sm:$0xff] %v3478_v24  ;;  %1841 = vadd.xlane.f32.xlu1 %v3478_v24  ;;  %v3482_v42 = vmax.f32 %v2543_v17, 0.0 }
 0x366   :  { %v2545_v54 = vpop.eup %2544 }
 0x367   :  { %2558 = vtanh.f32 %v1729_v61  ;;  %1977 = vst [vmem:[#allocation5 + $0xb0] sm:$0xff] %v3482_v42  ;;  %1839 = vadd.xlane.f32.xlu0 %v3482_v42  ;;  %v3486_v33 = vmax.f32 %v2545_v54, 0.0 }
 0x368   :  { %v2547_v46 = vpop.eup %2546 }
 0x369   :  { %1980 = vst [vmem:[#allocation5 + $0xc8] sm:$0xff] %v3486_v33  ;;  %1845 = vadd.xlane.f32.xlu1 %v3486_v33  ;;  %v3490_v51 = vmax.f32 %v2547_v46, 0.0 }
 0x36a   :  { %v2549_v5 = vpop.eup %2548 }
 0x36b   :  { %1979 = vst [vmem:[#allocation5 + $0xc0] sm:$0xff] %v3490_v51  ;;  %1843 = vadd.xlane.f32.xlu0 %v3490_v51  ;;  %v3494_v13 = vmax.f32 %v2549_v5, 0.0 }
 0x36c   :  { %v2551_v25 = vpop.eup %2550 }
 0x36d   :  { %1982 = vst [vmem:[#allocation5 + $0xd8] sm:$0xff] %v3494_v13  ;;  %1849 = vadd.xlane.f32.xlu1 %v3494_v13  ;;  %v3498_v37 = vmax.f32 %v2551_v25, 0.0 }
 0x36e   :  { %v2553_v45 = vpop.eup %2552 }
 0x36f   :  { %1981 = vst [vmem:[#allocation5 + $0xd0] sm:$0xff] %v3498_v37  ;;  %1847 = vadd.xlane.f32.xlu0 %v3498_v37  ;;  %v3502_v49 = vmax.f32 %v2553_v45, 0.0 }
 0x370   :  { %v2555_v56 = vpop.eup %2554 }
 0x371   :  { %1984 = vst [vmem:[#allocation5 + $0xe8] sm:$0xff] %v3502_v49  ;;  %1853 = vadd.xlane.f32.xlu1 %v3502_v49  ;;  %v3506_v58 = vmax.f32 %v2555_v56, 0.0 }
 0x372   :  { %v2557_v60 = vpop.eup %2556 }
 0x373   :  { %1983 = vst [vmem:[#allocation5 + $0xe0] sm:$0xff] %v3506_v58  ;;  %1851 = vadd.xlane.f32.xlu0 %v3506_v58  ;;  %v3510_v63 = vmax.f32 %v2557_v60, 0.0 }
 0x374   :  { %v2559_v1 = vpop.eup %2558 }
 0x375   :  { %v3512_v3 = vmax.f32 %v2559_v1, 0.0  ;;  %1986 = vst [vmem:[#allocation5 + $0xf8] sm:$0xff] %v3510_v63  ;;  %1857 = vadd.xlane.f32.xlu1 %v3510_v63 }
 0x377   :  { %1985 = vst [vmem:[#allocation5 + $0xf0] sm:$0xff] %v3512_v3  ;;  %1855 = vadd.xlane.f32.xlu0 %v3512_v3 }
 0x378   :  { %2635 = shalt.err (!%p2632_p4)
}
 0x379   :  { %s2669_s28 = smov 128   ;;  %s2670_s29 = smov 8  }
 0x37a   :  { %2074 = dma.vmem_to_hbm [thread:$0]  %s2069_s26, 4096, %s3568_s6, [#allocation6], %s2669_s28, %s2669_s28, %s2670_s29  }
 0x37b   :  { %s2671_s6 = smov [#allocation3]  }
 0x37c   :  { %s2056_s8 = sshll.u32 %s2671_s6, 4  ;;  %s2057_s8 = int_to_ptr.vmem [resolvable:$true] %s2056_s8 }
 0x37d   :  { %s2644_s9 = scalar_lea.vmem %s2057_s8, 4096  ;;  %p2649_p6 = scmp.lt.s32.totalorder %s2057_s8, %s2057_s8 }
 0x37e   :  { %p2645_p5 = scmp.ne.s32.totalorder %s2057_s8, %s2644_s9  ;;  %p2650_p7 = scmp.lt.s32.totalorder %s2644_s9, %s2644_s9 }
 0x380   :  { %p2651_p8 = por %p2650_p7, %p2649_p6 }
 0x382   :  { %p2652_p9 = pnand %p2651_p8, %p2645_p5 }
 0x3c2   :  { %v1798_v4 = vpop.xlane.xlu1 %1797 }
 0x3c3   :  { %vm1860_vm4 = vcmp.gt.f32.partialorder %v1798_v4, 0.0 }
 0x3c4   :  { %v1892_v6 = vsel %vm1860_vm4, %v1798_v4, 1.0  ;;  %v1796_v7 = vpop.xlane.xlu0 %1795 }
 0x3c5   :  { %2560 = vrcp.f32 %v1892_v6  ;;  %vm1859_vm5 = vcmp.gt.f32.partialorder %v1796_v7, 0.0 }
 0x3c6   :  { %v1891_v40 = vsel %vm1859_vm5, %v1796_v7, 1.0  ;;  %v1802_v0 = vpop.xlane.xlu1 %1801 }
 0x3c7   :  { %2562 = vrcp.f32 %v1891_v40  ;;  %vm1862_vm6 = vcmp.gt.f32.partialorder %v1802_v0, 0.0 }
 0x3c8   :  { %v1894_v27 = vsel %vm1862_vm6, %v1802_v0, 1.0  ;;  %v1800_v47 = vpop.xlane.xlu0 %1799 }
 0x3c9   :  { %2564 = vrcp.f32 %v1894_v27  ;;  %vm1861_vm7 = vcmp.gt.f32.partialorder %v1800_v47, 0.0 }
 0x3ca   :  { %v1893_v43 = vsel %vm1861_vm7, %v1800_v47, 1.0  ;;  %v1806_v26 = vpop.xlane.xlu1 %1805 }
 0x3cb   :  { %2566 = vrcp.f32 %v1893_v43  ;;  %vm1864_vm8 = vcmp.gt.f32.partialorder %v1806_v26, 0.0 }
 0x3cc   :  { %v1896_v21 = vsel %vm1864_vm8, %v1806_v26, 1.0  ;;  %v1804_v39 = vpop.xlane.xlu0 %1803 }
 0x3cd   :  { %2568 = vrcp.f32 %v1896_v21  ;;  %vm1863_vm9 = vcmp.gt.f32.partialorder %v1804_v39, 0.0 }
 0x3ce   :  { %v1895_v18 = vsel %vm1863_vm9, %v1804_v39, 1.0  ;;  %v1810_v57 = vpop.xlane.xlu1 %1809 }
 0x3cf   :  { %2570 = vrcp.f32 %v1895_v18  ;;  %vm1866_vm10 = vcmp.gt.f32.partialorder %v1810_v57, 0.0 }
 0x3d0   :  { %v1898_v19 = vsel %vm1866_vm10, %v1810_v57, 1.0  ;;  %v1808_v38 = vpop.xlane.xlu0 %1807 }
 0x3d1   :  { %2572 = vrcp.f32 %v1898_v19  ;;  %vm1865_vm11 = vcmp.gt.f32.partialorder %v1808_v38, 0.0 }
 0x3d2   :  { %v2561_v44 = vpop.eup %2560  ;;  %v1897_v11 = vsel %vm1865_vm11, %v1808_v38, 1.0  ;;  %v1814_v48 = vpop.xlane.xlu1 %1813 }
 0x3d3   :  { %v1988_v15 = vmul.f32 %v2561_v44, %v3390_v8  ;;  %2574 = vrcp.f32 %v1897_v11  ;;  %vm1868_vm12 = vcmp.gt.f32.partialorder %v1814_v48, 0.0 }
 0x3d4   :  { %v2563_v20 = vpop.eup %2562  ;;  %v1900_v12 = vsel %vm1868_vm12, %v1814_v48, 1.0  ;;  %v1812_v17 = vpop.xlane.xlu0 %1811 }
 0x3d5   :  { %2020 = vst [vmem:[#allocation3 + $0x8] sm:$0xff] %v1988_v15  ;;  %v1987_v30 = vmul.f32 %v2563_v20, %v3394_v29  ;;  %2576 = vrcp.f32 %v1900_v12  ;;  %vm1867_vm13 = vcmp.gt.f32.partialorder %v1812_v17, 0.0 }
 0x3d6   :  { %v2565_v61 = vpop.eup %2564  ;;  %v1899_v54 = vsel %vm1867_vm13, %v1812_v17, 1.0  ;;  %v1818_v46 = vpop.xlane.xlu1 %1817 }
 0x3d7   :  { %2019 = vst [vmem:[#allocation3] sm:$0xff] %v1987_v30  ;;  %v1990_v5 = vmul.f32 %v2565_v61, %v3398_v36  ;;  %2578 = vrcp.f32 %v1899_v54  ;;  %vm1870_vm14 = vcmp.gt.f32.partialorder %v1818_v46, 0.0 }
 0x3d8   :  { %v2567_v25 = vpop.eup %2566  ;;  %v1902_v8 = vsel %vm1870_vm14, %v1818_v46, 1.0  ;;  %v1816_v45 = vpop.xlane.xlu0 %1815 }
 0x3d9   :  { %2022 = vst [vmem:[#allocation3 + $0x18] sm:$0xff] %v1990_v5  ;;  %v1989_v56 = vmul.f32 %v2567_v25, %v3402_v35  ;;  %2580 = vrcp.f32 %v1902_v8  ;;  %vm1869_vm15 = vcmp.gt.f32.partialorder %v1816_v45, 0.0 }
 0x3da   :  { %v2569_v60 = vpop.eup %2568  ;;  %v1901_v29 = vsel %vm1869_vm15, %v1816_v45, 1.0  ;;  %v1822_v1 = vpop.xlane.xlu1 %1821 }
 0x3db   :  { %2021 = vst [vmem:[#allocation3 + $0x10] sm:$0xff] %v1989_v56  ;;  %v1992_v4 = vmul.f32 %v2569_v60, %v3406_v14  ;;  %2582 = vrcp.f32 %v1901_v29  ;;  %vm1872_vm0 = vcmp.gt.f32.partialorder %v1822_v1, 0.0 }
 0x3dc   :  { %v2571_v6 = vpop.eup %2570  ;;  %v1904_v36 = vsel %vm1872_vm0, %v1822_v1, 1.0  ;;  %v1820_v7 = vpop.xlane.xlu0 %1819 }
 0x3dd   :  { %2024 = vst [vmem:[#allocation3 + $0x28] sm:$0xff] %v1992_v4  ;;  %v1991_v40 = vmul.f32 %v2571_v6, %v3410_v28  ;;  %2584 = vrcp.f32 %v1904_v36  ;;  %vm1871_vm1 = vcmp.gt.f32.partialorder %v1820_v7, 0.0 }
 0x3de   :  { %v2573_v0 = vpop.eup %2572  ;;  %v1903_v35 = vsel %vm1871_vm1, %v1820_v7, 1.0  ;;  %v1826_v27 = vpop.xlane.xlu1 %1825 }
 0x3df   :  { %2023 = vst [vmem:[#allocation3 + $0x20] sm:$0xff] %v1991_v40  ;;  %v1994_v47 = vmul.f32 %v2573_v0, %v3414_v52  ;;  %2586 = vrcp.f32 %v1903_v35  ;;  %vm1874_vm2 = vcmp.gt.f32.partialorder %v1826_v27, 0.0 }
 0x3e0   :  { %v2575_v43 = vpop.eup %2574  ;;  %v1906_v14 = vsel %vm1874_vm2, %v1826_v27, 1.0  ;;  %v1824_v26 = vpop.xlane.xlu0 %1823 }
 0x3e1   :  { %2026 = vst [vmem:[#allocation3 + $0x38] sm:$0xff] %v1994_v47  ;;  %v1993_v21 = vmul.f32 %v2575_v43, %v3418_v53  ;;  %2588 = vrcp.f32 %v1906_v14  ;;  %vm1873_vm3 = vcmp.gt.f32.partialorder %v1824_v26, 0.0 }
 0x3e2   :  { %v2577_v39 = vpop.eup %2576  ;;  %v1905_v28 = vsel %vm1873_vm3, %v1824_v26, 1.0  ;;  %v1830_v18 = vpop.xlane.xlu1 %1829 }
 0x3e3   :  { %2025 = vst [vmem:[#allocation3 + $0x30] sm:$0xff] %v1993_v21  ;;  %v1996_v57 = vmul.f32 %v2577_v39, %v3422_v16  ;;  %2590 = vrcp.f32 %v1905_v28  ;;  %vm1876_vm4 = vcmp.gt.f32.partialorder %v1830_v18, 0.0 }
 0x3e4   :  { %v2579_v19 = vpop.eup %2578  ;;  %v1908_v52 = vsel %vm1876_vm4, %v1830_v18, 1.0  ;;  %v1828_v38 = vpop.xlane.xlu0 %1827 }
 0x3e5   :  { %2028 = vst [vmem:[#allocation3 + $0x48] sm:$0xff] %v1996_v57  ;;  %v1995_v44 = vmul.f32 %v2579_v19, %v3426_v22  ;;  %2592 = vrcp.f32 %v1908_v52  ;;  %vm1875_vm5 = vcmp.gt.f32.partialorder %v1828_v38, 0.0 }
 0x3e6   :  { %v2581_v11 = vpop.eup %2580  ;;  %v1907_v53 = vsel %vm1875_vm5, %v1828_v38, 1.0  ;;  %v1834_v48 = vpop.xlane.xlu1 %1833 }
 0x3e7   :  { %2027 = vst [vmem:[#allocation3 + $0x40] sm:$0xff] %v1995_v44  ;;  %v1998_v15 = vmul.f32 %v2581_v11, %v3430_v32  ;;  %2594 = vrcp.f32 %v1907_v53  ;;  %vm1878_vm6 = vcmp.gt.f32.partialorder %v1834_v48, 0.0 }
 0x3e8   :  { %v2583_v20 = vpop.eup %2582  ;;  %v1910_v16 = vsel %vm1878_vm6, %v1834_v48, 1.0  ;;  %v1832_v12 = vpop.xlane.xlu0 %1831 }
 0x3e9   :  { %2030 = vst [vmem:[#allocation3 + $0x58] sm:$0xff] %v1998_v15  ;;  %v1997_v17 = vmul.f32 %v2583_v20, %v3434_v59  ;;  %2596 = vrcp.f32 %v1910_v16  ;;  %vm1877_vm7 = vcmp.gt.f32.partialorder %v1832_v12, 0.0 }
 0x3ea   :  { %v2585_v30 = vpop.eup %2584  ;;  %v1909_v22 = vsel %vm1877_vm7, %v1832_v12, 1.0  ;;  %v1838_v61 = vpop.xlane.xlu1 %1837 }
 0x3eb   :  { %2029 = vst [vmem:[#allocation3 + $0x50] sm:$0xff] %v1997_v17  ;;  %v2000_v54 = vmul.f32 %v2585_v30, %v3438_v41  ;;  %2598 = vrcp.f32 %v1909_v22  ;;  %vm1880_vm8 = vcmp.gt.f32.partialorder %v1838_v61, 0.0 }
 0x3ec   :  { %v2587_v46 = vpop.eup %2586  ;;  %v1912_v32 = vsel %vm1880_vm8, %v1838_v61, 1.0  ;;  %v1836_v5 = vpop.xlane.xlu0 %1835 }
 0x3ed   :  { %2032 = vst [vmem:[#allocation3 + $0x68] sm:$0xff] %v2000_v54  ;;  %v1999_v25 = vmul.f32 %v2587_v46, %v3442_v55  ;;  %2600 = vrcp.f32 %v1912_v32  ;;  %vm1879_vm9 = vcmp.gt.f32.partialorder %v1836_v5, 0.0 }
 0x3ee   :  { %v2589_v8 = vpop.eup %2588  ;;  %v1911_v59 = vsel %vm1879_vm9, %v1836_v5, 1.0  ;;  %v1842_v45 = vpop.xlane.xlu1 %1841 }
 0x3ef   :  { %2031 = vst [vmem:[#allocation3 + $0x60] sm:$0xff] %v1999_v25  ;;  %v2002_v56 = vmul.f32 %v2589_v8, %v3446_v62  ;;  %2602 = vrcp.f32 %v1911_v59  ;;  %vm1882_vm10 = vcmp.gt.f32.partialorder %v1842_v45, 0.0 }
 0x3f0   :  { %v2591_v60 = vpop.eup %2590  ;;  %v1914_v41 = vsel %vm1882_vm10, %v1842_v45, 1.0  ;;  %v1840_v29 = vpop.xlane.xlu0 %1839 }
 0x3f1   :  { %2034 = vst [vmem:[#allocation3 + $0x78] sm:$0xff] %v2002_v56  ;;  %v2001_v1 = vmul.f32 %v2591_v60, %v3448_v2  ;;  %2604 = vrcp.f32 %v1914_v41  ;;  %vm1881_vm11 = vcmp.gt.f32.partialorder %v1840_v29, 0.0 }
 0x3f2   :  { %v2593_v4 = vpop.eup %2592  ;;  %v1913_v55 = vsel %vm1881_vm11, %v1840_v29, 1.0  ;;  %v1846_v6 = vpop.xlane.xlu1 %1845 }
 0x3f3   :  { %2033 = vst [vmem:[#allocation3 + $0x70] sm:$0xff] %v2001_v1  ;;  %v2004_v36 = vmul.f32 %v2593_v4, %v3454_v9  ;;  %2606 = vrcp.f32 %v1913_v55  ;;  %vm1884_vm12 = vcmp.gt.f32.partialorder %v1846_v6, 0.0 }
 0x3f4   :  { %v2595_v7 = vpop.eup %2594  ;;  %v1916_v62 = vsel %vm1884_vm12, %v1846_v6, 1.0  ;;  %v1844_v40 = vpop.xlane.xlu0 %1843 }
 0x3f5   :  { %2036 = vst [vmem:[#allocation3 + $0x88] sm:$0xff] %v2004_v36  ;;  %v2003_v0 = vmul.f32 %v2595_v7, %v3458_v34  ;;  %2608 = vrcp.f32 %v1916_v62  ;;  %vm1883_vm13 = vcmp.gt.f32.partialorder %v1844_v40, 0.0 }
 0x3f6   :  { %v2597_v35 = vpop.eup %2596  ;;  %v1915_v2 = vsel %vm1883_vm13, %v1844_v40, 1.0  ;;  %v1850_v27 = vpop.xlane.xlu1 %1849 }
 0x3f7   :  { %2035 = vst [vmem:[#allocation3 + $0x80] sm:$0xff] %v2003_v0  ;;  %v2006_v47 = vmul.f32 %v2597_v35, %v3462_v31  ;;  %2610 = vrcp.f32 %v1915_v2  ;;  %vm1886_vm14 = vcmp.gt.f32.partialorder %v1850_v27, 0.0 }
 0x3f8   :  { %v2599_v43 = vpop.eup %2598  ;;  %v1918_v9 = vsel %vm1886_vm14, %v1850_v27, 1.0  ;;  %v1848_v14 = vpop.xlane.xlu0 %1847 }
 0x3f9   :  { %2038 = vst [vmem:[#allocation3 + $0x98] sm:$0xff] %v2006_v47  ;;  %v2005_v26 = vmul.f32 %v2599_v43, %v3466_v23  ;;  %2612 = vrcp.f32 %v1918_v9  ;;  %vm1885_vm15 = vcmp.gt.f32.partialorder %v1848_v14, 0.0 }
 0x3fa   :  { %v2601_v21 = vpop.eup %2600  ;;  %v1917_v34 = vsel %vm1885_vm15, %v1848_v14, 1.0  ;;  %v1854_v39 = vpop.xlane.xlu1 %1853 }
 0x3fb   :  { %2037 = vst [vmem:[#allocation3 + $0x90] sm:$0xff] %v2005_v26  ;;  %v2008_v28 = vmul.f32 %v2601_v21, %v3470_v50  ;;  %2614 = vrcp.f32 %v1917_v34  ;;  %vm1888_vm0 = vcmp.gt.f32.partialorder %v1854_v39, 0.0 }
 0x3fc   :  { %v2603_v18 = vpop.eup %2602  ;;  %v1920_v31 = vsel %vm1888_vm0, %v1854_v39, 1.0  ;;  %v1852_v57 = vpop.xlane.xlu0 %1851 }
 0x3fd   :  { %2040 = vst [vmem:[#allocation3 + $0xa8] sm:$0xff] %v2008_v28  ;;  %v2007_v19 = vmul.f32 %v2603_v18, %v3474_v10  ;;  %2616 = vrcp.f32 %v1920_v31  ;;  %vm1887_vm1 = vcmp.gt.f32.partialorder %v1852_v57, 0.0 }
 0x3fe   :  { %v2605_v52 = vpop.eup %2604  ;;  %v1919_v23 = vsel %vm1887_vm1, %v1852_v57, 1.0  ;;  %v1858_v38 = vpop.xlane.xlu1 %1857 }
 0x3ff   :  { %2039 = vst [vmem:[#allocation3 + $0xa0] sm:$0xff] %v2007_v19  ;;  %v2010_v44 = vmul.f32 %v2605_v52, %v3478_v24  ;;  %2618 = vrcp.f32 %v1919_v23  ;;  %vm1890_vm2 = vcmp.gt.f32.partialorder %v1858_v38, 0.0 }
 0x400   :  { %v2607_v11 = vpop.eup %2606  ;;  %v1922_v50 = vsel %vm1890_vm2, %v1858_v38, 1.0  ;;  %v1856_v53 = vpop.xlane.xlu0 %1855 }
 0x401   :  { %2042 = vst [vmem:[#allocation3 + $0xb8] sm:$0xff] %v2010_v44  ;;  %v2009_v48 = vmul.f32 %v2607_v11, %v3482_v42  ;;  %2620 = vrcp.f32 %v1922_v50  ;;  %vm1889_vm3 = vcmp.gt.f32.partialorder %v1856_v53, 0.0 }
 0x402   :  { %v2609_v15 = vpop.eup %2608  ;;  %v1921_v10 = vsel %vm1889_vm3, %v1856_v53, 1.0 }
 0x403   :  { %2041 = vst [vmem:[#allocation3 + $0xb0] sm:$0xff] %v2009_v48  ;;  %v2012_v20 = vmul.f32 %v2609_v15, %v3486_v33  ;;  %2622 = vrcp.f32 %v1921_v10 }
 0x404   :  { %v2611_v16 = vpop.eup %2610 }
 0x405   :  { %2044 = vst [vmem:[#allocation3 + $0xc8] sm:$0xff] %v2012_v20  ;;  %v2011_v24 = vmul.f32 %v2611_v16, %v3490_v51 }
 0x406   :  { %v2613_v12 = vpop.eup %2612 }
 0x407   :  { %2043 = vst [vmem:[#allocation3 + $0xc0] sm:$0xff] %v2011_v24  ;;  %v2014_v17 = vmul.f32 %v2613_v12, %v3494_v13 }
 0x408   :  { %v2615_v30 = vpop.eup %2614 }
 0x409   :  { %2046 = vst [vmem:[#allocation3 + $0xd8] sm:$0xff] %v2014_v17  ;;  %v2013_v42 = vmul.f32 %v2615_v30, %v3498_v37 }
 0x40a   :  { %v2617_v22 = vpop.eup %2616 }
 0x40b   :  { %2045 = vst [vmem:[#allocation3 + $0xd0] sm:$0xff] %v2013_v42  ;;  %v2016_v61 = vmul.f32 %v2617_v22, %v3502_v49 }
 0x40c   :  { %v2619_v54 = vpop.eup %2618 }
 0x40d   :  { %2048 = vst [vmem:[#allocation3 + $0xe8] sm:$0xff] %v2016_v61  ;;  %v2015_v33 = vmul.f32 %v2619_v54, %v3506_v58 }
 0x40e   :  { %v2621_v46 = vpop.eup %2620 }
 0x40f   :  { %2047 = vst [vmem:[#allocation3 + $0xe0] sm:$0xff] %v2015_v33  ;;  %v2018_v51 = vmul.f32 %v2621_v46, %v3510_v63 }
 0x410   :  { %v2623_v32 = vpop.eup %2622 }
 0x411   :  { %2050 = vst [vmem:[#allocation3 + $0xf8] sm:$0xff] %v2018_v51  ;;  %v2017_v13 = vmul.f32 %v2623_v32, %v3512_v3 }
 0x413   :  { %2049 = vst [vmem:[#allocation3 + $0xf0] sm:$0xff] %v2017_v13 }
 0x414   :  { %2655 = shalt.err (!%p2652_p9)
}
 0x415   :  { %2062 = dma.vmem_to_hbm [thread:$0]  %s2057_s8, 4096, %s3567_s5, [#allocation4], %s2669_s28, %s2669_s28, %s2670_s29  }
 0x416   :  { %2664 = dma.done.wait [#allocation4], 4096  }
 0x417   :  { %2665 = vsyncadd [#allocation4], 4294963200 }
 0x418   :  { %2666 = dma.done.wait [#allocation6], 4096  }
 0x419   :  { %2667 = vsyncadd [#allocation6], 4294963200 }
 0x41a   :  { %2081 = vsyncpa [#allocation4], 1 }
 0x41b   :  { %2082 = vsyncpa [#allocation6], 1 }

</bundles_post_ra>
